<compile_context>
chip_gen: v7x
topology: tpu7x:2x2x1
jax: 0.10.0
libtpu: 0.0.40
codegen_flags: <defaults>
</compile_context>

<pallas_src>
from functools import partial

import jax
import jax.numpy as jnp
from jax.experimental import pallas as pl
from jax.experimental.pallas import tpu as pltpu


def _round_up(n, m):
    return ((n + m - 1) // m) * m


def _choose_tb(B):
    """Pick a batch tile: large, dividing B if possible (avoid wrapper pad)."""
    candidates = (512, 256, 128, 64, 32, 16, 8)
    divisors = [t for t in candidates if t <= B and B % t == 0]
    if divisors:
        # Prefer >=2 tiles while tiles stay DMA/MXU-friendly (>=256 rows) so
        # the "parallel" batch axis can shard across both v7x TensorCores.
        for t in divisors:
            if B // t >= 2 and t >= 256:
                return t
        return divisors[0]
    # Ragged batch: pad to a multiple of 8 rows (sublane granularity).
    b8 = _round_up(B, 8)
    for t in candidates:
        if t <= b8 and b8 % t == 0:
            return t
    return 8


def payment_classifier_kernel(
    x_ref, gamma_ref, beta_ref,
    w1_ref, b1_ref, w2_ref, b2_ref, w3_ref, b3_ref,
    out_ref,
):
    x = x_ref[...].astype(jnp.float32)                      # (TB, D) bf16 -> f32
    inv_d = 1.0 / x.shape[-1]

    # ---- LayerNorm (eps=1e-5, affine), two-pass variance for stability ----
    mean = jnp.sum(x, axis=-1, keepdims=True) * inv_d
    xc = x - mean
    var = jnp.sum(xc * xc, axis=-1, keepdims=True) * inv_d
    xn = xc * jax.lax.rsqrt(var + 1e-5) * gamma_ref[...] + beta_ref[...]

    # ---- fc1 + GELU (tanh approx -> EUP); dropout = identity in eval ----
    h1 = jnp.dot(xn.astype(jnp.bfloat16), w1_ref[...],
                 preferred_element_type=jnp.float32) + b1_ref[...]
    h1 = jax.nn.gelu(h1, approximate=True)

    # ---- fc2 + GELU ----
    h2 = jnp.dot(h1.astype(jnp.bfloat16), w2_ref[...],
                 preferred_element_type=jnp.float32) + b2_ref[...]
    h2 = jax.nn.gelu(h2, approximate=True)

    # ---- fc3 (logits, lane-padded to 128 classes; dense bf16 vst) ----
    logits = jnp.dot(h2.astype(jnp.bfloat16), w3_ref[...],
                     preferred_element_type=jnp.float32) + b3_ref[...]
    out_ref[...] = logits.astype(out_ref.dtype)


@partial(jax.jit, static_argnames=("num_classes",))
def payment_classifier(x, packed, *, num_classes):
    """x: (B, D) float/bf16; packed: output of pack_params(); returns (B, C) f32."""
    B, D = x.shape
    C_pad = packed["w3"].shape[1]                 # lane-padded class dim (>=128)

    TB = _choose_tb(B)
    B_pad = _round_up(B, TB)
    nb = B_pad // TB

    # Stream x as bf16 (halves the dominant HBM read). In a serving pipeline
    # the producer should already emit bf16 so this convert fuses upstream.
    x_b = x.astype(jnp.bfloat16)
    if B_pad != B:
        x_b = jnp.pad(x_b, ((0, B_pad - B), (0, 0)))   # only for ragged batches

    def resident(a):                                    # weights stay in VMEM
        return pl.BlockSpec(a.shape, lambda i: (0, 0))

    out_padded = pl.pallas_call(
        payment_classifier_kernel,
        out_shape=jax.ShapeDtypeStruct((B_pad, C_pad), jnp.bfloat16),
        grid=(nb,),
        in_specs=[
            pl.BlockSpec((TB, D), lambda i: (i, 0)),    # x tile (pipelined)
            resident(packed["gamma"]), resident(packed["beta"]),
            resident(packed["w1"]), resident(packed["b1"]),
            resident(packed["w2"]), resident(packed["b2"]),
            resident(packed["w3"]), resident(packed["b3"]),
        ],
        out_specs=pl.BlockSpec((TB, C_pad), lambda i: (i, 0)),
        compiler_params=pltpu.CompilerParams(
            dimension_semantics=("parallel",)),         # megacore on v7x
    )(x_b, packed["gamma"], packed["beta"],
      packed["w1"], packed["b1"], packed["w2"], packed["b2"],
      packed["w3"], packed["b3"])

    return out_padded[:B, :num_classes].astype(jnp.float32)


def pack_params(params):
    """One-time packing for serving: bf16 weights, lane-padded fc3, f32 biases.

    Do this ONCE outside the per-call path; payment_classifier takes the
    packed dict directly (no per-inference cast/pad of weights).
    """
    C = params["w3"].shape[1]
    C_pad = _round_up(C, 128)
    packed = {
        "gamma": params["gamma"].astype(jnp.float32).reshape(1, -1),
        "beta": params["beta"].astype(jnp.float32).reshape(1, -1),
        "w1": params["w1"].astype(jnp.bfloat16),
        "b1": params["b1"].astype(jnp.float32).reshape(1, -1),
        "w2": params["w2"].astype(jnp.bfloat16),
        "b2": params["b2"].astype(jnp.float32).reshape(1, -1),
        "w3": jnp.pad(params["w3"].astype(jnp.bfloat16),
                      ((0, 0), (0, C_pad - C))),
        "b3": jnp.pad(params["b3"].astype(jnp.float32).reshape(1, -1),
                      ((0, 0), (0, C_pad - C))),
    }
    return packed, C


def init_params(key, input_dim=1024, hidden_dims=(512, 256), num_classes=9):
    """Deterministic synthetic params (PyTorch-like uniform init).

    Weights are stored bf16 (serving precision, same quantization seen by the
    reference); biases/gamma/beta stay f32. Weights are (in, out): x @ W.
    """
    ks = jax.random.split(key, 6)

    def linear(kw, kb, fan_in, fan_out):
        bound = 1.0 / jnp.sqrt(fan_in)
        w = jax.random.uniform(kw, (fan_in, fan_out), jnp.float32, -bound, bound)
        b = jax.random.uniform(kb, (1, fan_out), jnp.float32, -bound, bound)
        return w.astype(jnp.bfloat16), b

    w1, b1 = linear(ks[0], ks[1], input_dim, hidden_dims[0])
    w2, b2 = linear(ks[2], ks[3], hidden_dims[0], hidden_dims[1])
    w3, b3 = linear(ks[4], ks[5], hidden_dims[1], num_classes)
    return {
        "gamma": jnp.ones((1, input_dim), jnp.float32),
        "beta": jnp.zeros((1, input_dim), jnp.float32),
        "w1": w1, "b1": b1,
        "w2": w2, "b2": b2,
        "w3": w3, "b3": b3,
    }


def reference_forward(x, params):
    """Pure-JAX reference of the PyTorch forward (eval mode), f32 math."""
    x = x.astype(jnp.float32)
    mean = jnp.mean(x, axis=-1, keepdims=True)
    var = jnp.mean((x - mean) ** 2, axis=-1, keepdims=True)
    xn = (x - mean) / jnp.sqrt(var + 1e-5) * params["gamma"] + params["beta"]
    h1 = jax.nn.gelu(xn @ params["w1"].astype(jnp.float32) + params["b1"],
                     approximate=False)
    h2 = jax.nn.gelu(h1 @ params["w2"].astype(jnp.float32) + params["b2"],
                     approximate=False)
    return h2 @ params["w3"].astype(jnp.float32) + params["b3"]


if __name__ == "__main__":
    key = jax.random.PRNGKey(0)
    k_x, k_p = jax.random.split(key)

    B, D = 8, 1024
    x = jax.random.normal(k_x, (B, D), jnp.float32)
    raw_params = init_params(k_p, input_dim=D, hidden_dims=(512, 256),
                             num_classes=9)
    packed, num_classes = pack_params(raw_params)   # one-time packing

    out = payment_classifier(x, packed, num_classes=num_classes)
    out = jax.block_until_ready(out)

    ref = reference_forward(x, raw_params)
    assert out.shape == (B, 9), out.shape
    # bf16 activation stream + bf16 MXU path + tanh-GELU + bf16 logits vs.
    # f32-math exact-erf reference: allow a correspondingly looser tolerance.
    max_err = float(jnp.max(jnp.abs(out - ref)))
    assert jnp.allclose(out, ref, atol=3e-2, rtol=3e-2), max_err

    print("KERNEL_OK")
</pallas_src>

<mosaic_0001>
module attributes {stable_mosaic.version = 11 : i64} {
  func.func @payment_classifier_kernel(%arg0: i32, %arg1: memref<8x1024xbf16, #tpu.memory_space<vmem>>, %arg2: memref<1x1024xf32, #tpu.memory_space<vmem>>, %arg3: memref<1x1024xf32, #tpu.memory_space<vmem>>, %arg4: memref<1024x512xbf16, #tpu.memory_space<vmem>>, %arg5: memref<1x512xf32, #tpu.memory_space<vmem>>, %arg6: memref<512x256xbf16, #tpu.memory_space<vmem>>, %arg7: memref<1x256xf32, #tpu.memory_space<vmem>>, %arg8: memref<256x128xbf16, #tpu.memory_space<vmem>>, %arg9: memref<1x128xf32, #tpu.memory_space<vmem>>, %arg10: memref<8x128xbf16, #tpu.memory_space<vmem>>) attributes {dimension_semantics = [#tpu.dimension_semantics<parallel>], iteration_bounds = array<i64: 1>, scalar_prefetch = 0 : i64, scratch_operands = 0 : i64, tpu.core_type = #tpu.core_type<tc>, window_params = [{transform_indices = @transform_0, window_bounds = array<i64: 8, 1024>}, {pipeline_mode = #tpu.pipeline_mode<synchronous>, transform_indices = @transform_1, window_bounds = array<i64: 1, 1024>}, {pipeline_mode = #tpu.pipeline_mode<synchronous>, transform_indices = @transform_2, window_bounds = array<i64: 1, 1024>}, {pipeline_mode = #tpu.pipeline_mode<synchronous>, transform_indices = @transform_3, window_bounds = array<i64: 1024, 512>}, {pipeline_mode = #tpu.pipeline_mode<synchronous>, transform_indices = @transform_4, window_bounds = array<i64: 1, 512>}, {pipeline_mode = #tpu.pipeline_mode<synchronous>, transform_indices = @transform_5, window_bounds = array<i64: 512, 256>}, {pipeline_mode = #tpu.pipeline_mode<synchronous>, transform_indices = @transform_6, window_bounds = array<i64: 1, 256>}, {pipeline_mode = #tpu.pipeline_mode<synchronous>, transform_indices = @transform_7, window_bounds = array<i64: 256, 128>}, {pipeline_mode = #tpu.pipeline_mode<synchronous>, transform_indices = @transform_8, window_bounds = array<i64: 1, 128>}, {transform_indices = @transform_9, window_bounds = array<i64: 8, 128>}]} {
    %c0 = arith.constant 0 : index
    %c0_0 = arith.constant 0 : index
    %0 = vector.load %arg1[%c0, %c0_0] : memref<8x1024xbf16, #tpu.memory_space<vmem>>, vector<8x1024xbf16>
    %1 = arith.extf %0 : vector<8x1024xbf16> to vector<8x1024xf32>
    %cst = arith.constant dense<0.000000e+00> : vector<8xf32>
    %2 = vector.multi_reduction <add>, %1, %cst [1] : vector<8x1024xf32> to vector<8xf32>
    %3 = vector.shape_cast %2 : vector<8xf32> to vector<8x1xf32>
    %cst_1 = arith.constant 9.765625E-4 : f32
    %4 = vector.broadcast %cst_1 : f32 to vector<8x1xf32>
    %5 = arith.mulf %3, %4 : vector<8x1xf32>
    %6 = vector.broadcast %5 : vector<8x1xf32> to vector<8x1024xf32>
    %7 = arith.subf %1, %6 : vector<8x1024xf32>
    %8 = arith.mulf %7, %7 : vector<8x1024xf32>
    %cst_2 = arith.constant dense<0.000000e+00> : vector<8xf32>
    %9 = vector.multi_reduction <add>, %8, %cst_2 [1] : vector<8x1024xf32> to vector<8xf32>
    %10 = vector.shape_cast %9 : vector<8xf32> to vector<8x1xf32>
    %cst_3 = arith.constant 9.765625E-4 : f32
    %11 = vector.broadcast %cst_3 : f32 to vector<8x1xf32>
    %12 = arith.mulf %10, %11 : vector<8x1xf32>
    %cst_4 = arith.constant 9.99999974E-6 : f32
    %13 = vector.broadcast %cst_4 : f32 to vector<8x1xf32>
    %14 = arith.addf %12, %13 : vector<8x1xf32>
    %15 = math.rsqrt %14 : vector<8x1xf32>
    %16 = vector.broadcast %15 : vector<8x1xf32> to vector<8x1024xf32>
    %17 = arith.mulf %7, %16 : vector<8x1024xf32>
    %c0_5 = arith.constant 0 : index
    %c0_6 = arith.constant 0 : index
    %18 = vector.load %arg2[%c0_5, %c0_6] : memref<1x1024xf32, #tpu.memory_space<vmem>>, vector<1x1024xf32>
    %19 = vector.broadcast %18 : vector<1x1024xf32> to vector<8x1024xf32>
    %20 = arith.mulf %17, %19 : vector<8x1024xf32>
    %c0_7 = arith.constant 0 : index
    %c0_8 = arith.constant 0 : index
    %21 = vector.load %arg3[%c0_7, %c0_8] : memref<1x1024xf32, #tpu.memory_space<vmem>>, vector<1x1024xf32>
    %22 = vector.broadcast %21 : vector<1x1024xf32> to vector<8x1024xf32>
    %23 = arith.addf %20, %22 : vector<8x1024xf32>
    %24 = arith.truncf %23 : vector<8x1024xf32> to vector<8x1024xbf16>
    %c0_9 = arith.constant 0 : index
    %c0_10 = arith.constant 0 : index
    %25 = vector.load %arg4[%c0_9, %c0_10] : memref<1024x512xbf16, #tpu.memory_space<vmem>>, vector<1024x512xbf16>
    %cst_11 = arith.constant dense<0.000000e+00> : vector<8x512xf32>
    %26 = tpu.matmul %24, %25, %cst_11 {dimension_numbers = #tpu.dot_dimension_numbers<[1], [0], [0], [1], [0, 0, 1, 1], [], []>} : vector<8x1024xbf16>, vector<1024x512xbf16>, vector<8x512xf32> -> vector<8x512xf32>
    %c0_12 = arith.constant 0 : index
    %c0_13 = arith.constant 0 : index
    %27 = vector.load %arg5[%c0_12, %c0_13] : memref<1x512xf32, #tpu.memory_space<vmem>>, vector<1x512xf32>
    %28 = vector.broadcast %27 : vector<1x512xf32> to vector<8x512xf32>
    %29 = arith.addf %26, %28 : vector<8x512xf32>
    %30 = arith.mulf %29, %29 : vector<8x512xf32>
    %31 = arith.mulf %29, %30 : vector<8x512xf32>
    %cst_14 = arith.constant 4.471500e-02 : f32
    %32 = vector.broadcast %cst_14 : f32 to vector<8x512xf32>
    %33 = arith.mulf %32, %31 : vector<8x512xf32>
    %34 = arith.addf %29, %33 : vector<8x512xf32>
    %cst_15 = arith.constant 0.797884583 : f32
    %35 = vector.broadcast %cst_15 : f32 to vector<8x512xf32>
    %36 = arith.mulf %35, %34 : vector<8x512xf32>
    %37 = math.tanh %36 : vector<8x512xf32>
    %cst_16 = arith.constant 1.000000e+00 : f32
    %38 = vector.broadcast %cst_16 : f32 to vector<8x512xf32>
    %39 = arith.addf %38, %37 : vector<8x512xf32>
    %cst_17 = arith.constant 5.000000e-01 : f32
    %40 = vector.broadcast %cst_17 : f32 to vector<8x512xf32>
    %41 = arith.mulf %40, %39 : vector<8x512xf32>
    %42 = arith.mulf %29, %41 : vector<8x512xf32>
    %43 = arith.truncf %42 : vector<8x512xf32> to vector<8x512xbf16>
    %c0_18 = arith.constant 0 : index
    %c0_19 = arith.constant 0 : index
    %44 = vector.load %arg6[%c0_18, %c0_19] : memref<512x256xbf16, #tpu.memory_space<vmem>>, vector<512x256xbf16>
    %cst_20 = arith.constant dense<0.000000e+00> : vector<8x256xf32>
    %45 = tpu.matmul %43, %44, %cst_20 {dimension_numbers = #tpu.dot_dimension_numbers<[1], [0], [0], [1], [0, 0, 1, 1], [], []>} : vector<8x512xbf16>, vector<512x256xbf16>, vector<8x256xf32> -> vector<8x256xf32>
    %c0_21 = arith.constant 0 : index
    %c0_22 = arith.constant 0 : index
    %46 = vector.load %arg7[%c0_21, %c0_22] : memref<1x256xf32, #tpu.memory_space<vmem>>, vector<1x256xf32>
    %47 = vector.broadcast %46 : vector<1x256xf32> to vector<8x256xf32>
    %48 = arith.addf %45, %47 : vector<8x256xf32>
    %49 = arith.mulf %48, %48 : vector<8x256xf32>
    %50 = arith.mulf %48, %49 : vector<8x256xf32>
    %cst_23 = arith.constant 4.471500e-02 : f32
    %51 = vector.broadcast %cst_23 : f32 to vector<8x256xf32>
    %52 = arith.mulf %51, %50 : vector<8x256xf32>
    %53 = arith.addf %48, %52 : vector<8x256xf32>
    %cst_24 = arith.constant 0.797884583 : f32
    %54 = vector.broadcast %cst_24 : f32 to vector<8x256xf32>
    %55 = arith.mulf %54, %53 : vector<8x256xf32>
    %56 = math.tanh %55 : vector<8x256xf32>
    %cst_25 = arith.constant 1.000000e+00 : f32
    %57 = vector.broadcast %cst_25 : f32 to vector<8x256xf32>
    %58 = arith.addf %57, %56 : vector<8x256xf32>
    %cst_26 = arith.constant 5.000000e-01 : f32
    %59 = vector.broadcast %cst_26 : f32 to vector<8x256xf32>
    %60 = arith.mulf %59, %58 : vector<8x256xf32>
    %61 = arith.mulf %48, %60 : vector<8x256xf32>
    %62 = arith.truncf %61 : vector<8x256xf32> to vector<8x256xbf16>
    %c0_27 = arith.constant 0 : index
    %c0_28 = arith.constant 0 : index
    %63 = vector.load %arg8[%c0_27, %c0_28] : memref<256x128xbf16, #tpu.memory_space<vmem>>, vector<256x128xbf16>
    %cst_29 = arith.constant dense<0.000000e+00> : vector<8x128xf32>
    %64 = tpu.matmul %62, %63, %cst_29 {dimension_numbers = #tpu.dot_dimension_numbers<[1], [0], [0], [1], [0, 0, 1, 1], [], []>} : vector<8x256xbf16>, vector<256x128xbf16>, vector<8x128xf32> -> vector<8x128xf32>
    %c0_30 = arith.constant 0 : index
    %c0_31 = arith.constant 0 : index
    %65 = vector.load %arg9[%c0_30, %c0_31] : memref<1x128xf32, #tpu.memory_space<vmem>>, vector<1x128xf32>
    %66 = vector.broadcast %65 : vector<1x128xf32> to vector<8x128xf32>
    %67 = arith.addf %64, %66 : vector<8x128xf32>
    %68 = arith.truncf %67 : vector<8x128xf32> to vector<8x128xbf16>
    %c0_32 = arith.constant 0 : index
    %c0_33 = arith.constant 0 : index
    %69 = vector.load %arg10[%c0_32, %c0_33] : memref<8x128xbf16, #tpu.memory_space<vmem>>, vector<8x128xbf16>
    tpu.vector_store %arg10[%c0_32, %c0_33], %68 {strides = array<i32>} : memref<8x128xbf16, #tpu.memory_space<vmem>>, vector<8x128xbf16>,
    return
  }
  func.func @transform_0(%arg0: i32) -> (i32, i32) {
    %c0_i32 = arith.constant 0 : i32
    %c0_i32_0 = arith.constant 0 : i32
    return %arg0, %c0_i32 : i32, i32
  }
  func.func @transform_1(%arg0: i32) -> (i32, i32) {
    %c0_i32 = arith.constant 0 : i32
    %c0_i32_0 = arith.constant 0 : i32
    %c0_i32_1 = arith.constant 0 : i32
    return %c0_i32, %c0_i32_0 : i32, i32
  }
  func.func @transform_2(%arg0: i32) -> (i32, i32) {
    %c0_i32 = arith.constant 0 : i32
    %c0_i32_0 = arith.constant 0 : i32
    %c0_i32_1 = arith.constant 0 : i32
    return %c0_i32, %c0_i32_0 : i32, i32
  }
  func.func @transform_3(%arg0: i32) -> (i32, i32) {
    %c0_i32 = arith.constant 0 : i32
    %c0_i32_0 = arith.constant 0 : i32
    %c0_i32_1 = arith.constant 0 : i32
    return %c0_i32, %c0_i32_0 : i32, i32
  }
  func.func @transform_4(%arg0: i32) -> (i32, i32) {
    %c0_i32 = arith.constant 0 : i32
    %c0_i32_0 = arith.constant 0 : i32
    %c0_i32_1 = arith.constant 0 : i32
    return %c0_i32, %c0_i32_0 : i32, i32
  }
  func.func @transform_5(%arg0: i32) -> (i32, i32) {
    %c0_i32 = arith.constant 0 : i32
    %c0_i32_0 = arith.constant 0 : i32
    %c0_i32_1 = arith.constant 0 : i32
    return %c0_i32, %c0_i32_0 : i32, i32
  }
  func.func @transform_6(%arg0: i32) -> (i32, i32) {
    %c0_i32 = arith.constant 0 : i32
    %c0_i32_0 = arith.constant 0 : i32
    %c0_i32_1 = arith.constant 0 : i32
    return %c0_i32, %c0_i32_0 : i32, i32
  }
  func.func @transform_7(%arg0: i32) -> (i32, i32) {
    %c0_i32 = arith.constant 0 : i32
    %c0_i32_0 = arith.constant 0 : i32
    %c0_i32_1 = arith.constant 0 : i32
    return %c0_i32, %c0_i32_0 : i32, i32
  }
  func.func @transform_8(%arg0: i32) -> (i32, i32) {
    %c0_i32 = arith.constant 0 : i32
    %c0_i32_0 = arith.constant 0 : i32
    %c0_i32_1 = arith.constant 0 : i32
    return %c0_i32, %c0_i32_0 : i32, i32
  }
  func.func @transform_9(%arg0: i32) -> (i32, i32) {
    %c0_i32 = arith.constant 0 : i32
    %c0_i32_0 = arith.constant 0 : i32
    return %arg0, %c0_i32 : i32, i32
  }
}

</mosaic_0001>

<bundles_post_ra>
// kernel: payment_classifier.1
= control target key start
LH: loop header
LB: loop body
LE: loop exit
PB: predicated region body
PF: predicated region fallthrough
CT: control target
= control target key end

     0   :  { %14 = vsyncpa [#allocation3], 0  ;;  %s4114_s0 = inlined_call_operand.vmem [shape: bf16[8,1024], index: 0, kind: input, shape index: {}]   ;;  %s4115_s1 = inlined_call_operand.vmem [shape: f32[1,1024], index: 1, kind: input, shape index: {}]   ;;  %s4116_s2 = inlined_call_operand.vmem [shape: f32[1,1024], index: 2, kind: input, shape index: {}]   ;;  %s4117_s3 = inlined_call_operand.hbm [shape: bf16[1024,512], index: 3, kind: input, shape index: {}]   ;;  %s4118_s4 = inlined_call_operand.vmem [shape: f32[1,512], index: 4, kind: input, shape index: {}]   ;;  %s4119_s5 = inlined_call_operand.hbm [shape: bf16[512,256], index: 5, kind: input, shape index: {}]   ;;  %s4120_s6 = inlined_call_operand.vmem [shape: f32[1,256], index: 6, kind: input, shape index: {}]   ;;  %s4121_s7 = inlined_call_operand.hbm [shape: bf16[256,128], index: 7, kind: input, shape index: {}]   ;;  %s4122_s8 = inlined_call_operand.vmem [shape: f32[1,128], index: 8, kind: input, shape index: {}]   ;;  %s4123_s9 = inlined_call_operand.vmem [shape: bf16[8,128], index: 9, kind: output, shape index: {}]  }
   0x1   :  { %15 = vsyncpa [#allocation5], 0  ;;  %s3827_s30 = smov [#allocation4]   ;;  %s3757_s13 = scalar_lea.hbm %s4119_s5, 8192 }
   0x2   :  { %s41_s10 = sshll.u32 %s3827_s30, 4  ;;  %p3758_p0 = scmp.ne.s32.totalorder %s4119_s5, %s3757_s13  ;;  %s42_s10 = int_to_ptr.vmem [resolvable:$true] %s41_s10 }
   0x3   :  { %p3761_p1 = scmp.lt.u32.totalorder %s3757_s13, %s4119_s5 }
   0x5   :  { %p3763_p2 = pnand %p3761_p1, %p3758_p0 }
   0x7   :  { %3766 = shalt.err (!%p3763_p2)
}
   0x8   :  { %s3767_s18 = scalar_lea.vmem %s42_s10, 8192  ;;  %p3772_p4 = scmp.lt.s32.totalorder %s42_s10, %s42_s10 }
   0x9   :  { %p3768_p3 = scmp.ne.s32.totalorder %s42_s10, %s3767_s18  ;;  %p3773_p5 = scmp.lt.s32.totalorder %s3767_s18, %s3767_s18 }
   0xb   :  { %p3774_p6 = por %p3773_p5, %p3772_p4 }
   0xd   :  { %p3775_p7 = pnand %p3774_p6, %p3768_p3 }
   0xf   :  { %3778 = shalt.err (!%p3775_p7)
}
  0x10   :  { %s3828_s19 = smov 128   ;;  %s3829_s20 = smov 8  }
  0x11   :  { %47 = dma.hbm_to_vmem [thread:$0]  %s4119_s5, 8192, %s42_s10, [#allocation5], %s3828_s19, %s3828_s19, %s3829_s20  }
  0x12   :  { %s3830_s23 = smov [#allocation2]   ;;  %s3779_s27 = scalar_lea.hbm %s4117_s3, 32768 }
  0x13   :  { %s27_s24 = sshll.u32 %s3830_s23, 4  ;;  %p3780_p8 = scmp.ne.s32.totalorder %s4117_s3, %s3779_s27  ;;  %s28_s24 = int_to_ptr.vmem [resolvable:$true] %s27_s24 }
  0x14   :  { %p3783_p9 = scmp.lt.u32.totalorder %s3779_s27, %s4117_s3 }
  0x16   :  { %p3785_p10 = pnand %p3783_p9, %p3780_p8 }
  0x18   :  { %3788 = shalt.err (!%p3785_p10)
}
  0x19   :  { %s3789_s12 = scalar_lea.vmem %s28_s24, 32768  ;;  %p3794_p12 = scmp.lt.s32.totalorder %s28_s24, %s28_s24 }
  0x1a   :  { %p3790_p11 = scmp.ne.s32.totalorder %s28_s24, %s3789_s12  ;;  %p3795_p13 = scmp.lt.s32.totalorder %s3789_s12, %s3789_s12 }
  0x1c   :  { %p3796_p0 = por %p3795_p13, %p3794_p12 }
  0x1e   :  { %p3797_p1 = pnand %p3796_p0, %p3790_p11 }
  0x20   :  { %3800 = shalt.err (!%p3797_p1)
}
  0x21   :  { %s3831_s5 = smov 256   ;;  %s3832_s10 = smov 16  }
  0x22   :  { %33 = dma.hbm_to_vmem [thread:$0]  %s4117_s3, 32768, %s28_s24, [#allocation3], %s3831_s5, %s3831_s5, %s3832_s10  }
  0x23   :  { %s3833_s15 = smov [#allocation6]   ;;  %s3801_s19 = scalar_lea.hbm %s4121_s7, 2048 }
  0x24   :  { %s55_s16 = sshll.u32 %s3833_s15, 4  ;;  %p3802_p2 = scmp.ne.s32.totalorder %s4121_s7, %s3801_s19  ;;  %s56_s16 = int_to_ptr.vmem [resolvable:$true] %s55_s16 }
  0x25   :  { %p3805_p3 = scmp.lt.u32.totalorder %s3801_s19, %s4121_s7 }
  0x27   :  { %p3807_p4 = pnand %p3805_p3, %p3802_p2 }
  0x29   :  { %3810 = shalt.err (!%p3807_p4)
}
  0x2a   :  { %s3811_s25 = scalar_lea.vmem %s56_s16, 2048  ;;  %p3816_p6 = scmp.lt.s32.totalorder %s56_s16, %s56_s16 }
  0x2b   :  { %p3812_p5 = scmp.ne.s32.totalorder %s56_s16, %s3811_s25  ;;  %p3817_p7 = scmp.lt.s32.totalorder %s3811_s25, %s3811_s25 }
  0x2d   :  { %p3818_p8 = por %p3817_p7, %p3816_p6 }
  0x2f   :  { %p3819_p9 = pnand %p3818_p8, %p3812_p5 }
  0x31   :  { %3822 = shalt.err (!%p3819_p9)
}
  0x32   :  { %s3834_s3 = smov 64   ;;  %s3835_s24 = smov 4  }
  0x33   :  { %61 = dma.hbm_to_vmem [thread:$0]  %s4121_s7, 2048, %s56_s16, [#allocation5], %s3834_s3, %s3834_s3, %s3835_s24  }
  0x34   :  { %3823 = dma.done.wait [#allocation3], 32768  }
  0x35   :  { %3824 = vsyncadd [#allocation3], 4294934528 }
  0x36   :  { %3825 = dma.done.wait [#allocation5], 10240  }
  0x37   :  { %3826 = vsyncadd [#allocation5], 4294957056  ;;  %v3925_v0 = vld [vmem:[%s4114_s0] sm:$0xff]  ;;  %v3930_v1 = vld [vmem:[%s4114_s0 + $0x8] sm:$0xff] }
  0x38   :  { %v3935_v2 = vld [vmem:[%s4114_s0 + $0x10] sm:$0xff]  ;;  %v78_v3 = vunpack.c.l.bf16 %v3925_v0  ;;  %v79_v4 = vunpack.c.h.bf16 %v3925_v0  ;;  %v80_v5 = vunpack.c.l.bf16 %v3930_v1  ;;  %v81_v6 = vunpack.c.h.bf16 %v3930_v1  ;;  %v3948_v8 = vld [vmem:[%s4114_s0 + $0x18] sm:$0xff] }
  0x39   :  { %v82_v9 = vunpack.c.l.bf16 %v3935_v2  ;;  %v83_v11 = vunpack.c.h.bf16 %v3935_v2  ;;  %v84_v13 = vunpack.c.l.bf16 %v3948_v8  ;;  %v85_v15 = vunpack.c.h.bf16 %v3948_v8  ;;  %v3247_v19 = vld [vmem:[#allocation2 + $0x4] ss:$16 sps:$4 sm:$0xff]   ;;  %v3251_v21 = vld [vmem:[#allocation2] ss:$16 sps:$4 sm:$0xff]  }
  0x3a   :  { %v86_v7 = vadd.f32 %v79_v4, %v78_v3  ;;  %v3249_v20 = vld [vmem:[#allocation2 + $0x204] ss:$16 sps:$4 sm:$0xff]   ;;  %v3252_v22 = vld [vmem:[#allocation2 + $0x200] ss:$16 sps:$4 sm:$0xff]   ;;  %1798 = vmatprep.subr.bf16.mxu1 %v3247_v19 }
  0x3b   :  { %v3253_v23 = vld [vmem:[#allocation2 + $0x24] ss:$16 sps:$4 sm:$0xff]   ;;  %1839 = vmatprep.subr.bf16.mxu0 %v3249_v20  ;;  %1799 = vmatpush1.bf16.msra.mxu1 %v3251_v21  ;;  %v3257_v25 = vld [vmem:[#allocation2 + $0x20] ss:$16 sps:$4 sm:$0xff]  }
  0x3c   :  { %v87_v10 = vadd.f32 %v86_v7, %v80_v5  ;;  %v3255_v24 = vld [vmem:[#allocation2 + $0x224] ss:$16 sps:$4 sm:$0xff]   ;;  %1840 = vmatpush1.bf16.msra.mxu0 %v3252_v22  ;;  %v3258_v26 = vld [vmem:[#allocation2 + $0x220] ss:$16 sps:$4 sm:$0xff]   ;;  %1800 = vmatprep.subr.bf16.mxu1 %v3253_v23 }
  0x3d   :  { %1841 = vmatprep.subr.bf16.mxu0 %v3255_v24  ;;  %v3259_v27 = vld [vmem:[#allocation2 + $0x44] ss:$16 sps:$4 sm:$0xff]   ;;  %v3263_v29 = vld [vmem:[#allocation2 + $0x40] ss:$16 sps:$4 sm:$0xff]  }
  0x3e   :  { %v88_v12 = vadd.f32 %v87_v10, %v81_v6  ;;  %v3261_v28 = vld [vmem:[#allocation2 + $0x244] ss:$16 sps:$4 sm:$0xff]   ;;  %v3264_v30 = vld [vmem:[#allocation2 + $0x240] ss:$16 sps:$4 sm:$0xff]  }
  0x3f   :  { %1801 = vmatpush1.bf16.msra.mxu1 %v3257_v25  ;;  %v3265_v31 = vld [vmem:[#allocation2 + $0x64] ss:$16 sps:$4 sm:$0xff]   ;;  %v3269_v33 = vld [vmem:[#allocation2 + $0x60] ss:$16 sps:$4 sm:$0xff]  }
  0x40   :  { %v89_v14 = vadd.f32 %v88_v12, %v82_v9  ;;  %1842 = vmatpush1.bf16.msra.mxu0 %v3258_v26  ;;  %1802 = vmatprep.subr.bf16.mxu1 %v3259_v27  ;;  %v3267_v32 = vld [vmem:[#allocation2 + $0x264] ss:$16 sps:$4 sm:$0xff]   ;;  %v3270_v34 = vld [vmem:[#allocation2 + $0x260] ss:$16 sps:$4 sm:$0xff]  }
  0x41   :  { %1843 = vmatprep.subr.bf16.mxu0 %v3261_v28  ;;  %v3271_v35 = vld [vmem:[#allocation2 + $0x84] ss:$16 sps:$4 sm:$0xff]   ;;  %v3275_v37 = vld [vmem:[#allocation2 + $0x80] ss:$16 sps:$4 sm:$0xff]  }
  0x42   :  { %v90_v16 = vadd.f32 %v89_v14, %v83_v11  ;;  %v3273_v36 = vld [vmem:[#allocation2 + $0x284] ss:$16 sps:$4 sm:$0xff]   ;;  %v3276_v38 = vld [vmem:[#allocation2 + $0x280] ss:$16 sps:$4 sm:$0xff]  }
  0x43   :  { %1803 = vmatpush1.bf16.msra.mxu1 %v3263_v29  ;;  %v3277_v39 = vld [vmem:[#allocation2 + $0xa4] ss:$16 sps:$4 sm:$0xff]   ;;  %v3281_v41 = vld [vmem:[#allocation2 + $0xa0] ss:$16 sps:$4 sm:$0xff]  }
  0x44   :  { %v91_v17 = vadd.f32 %v90_v16, %v84_v13  ;;  %1844 = vmatpush1.bf16.msra.mxu0 %v3264_v30  ;;  %1804 = vmatprep.subr.bf16.mxu1 %v3265_v31  ;;  %v3279_v40 = vld [vmem:[#allocation2 + $0x2a4] ss:$16 sps:$4 sm:$0xff]   ;;  %v3282_v42 = vld [vmem:[#allocation2 + $0x2a0] ss:$16 sps:$4 sm:$0xff]  }
  0x45   :  { %1845 = vmatprep.subr.bf16.mxu0 %v3267_v32  ;;  %v3283_v43 = vld [vmem:[#allocation2 + $0xc4] ss:$16 sps:$4 sm:$0xff]   ;;  %v3287_v45 = vld [vmem:[#allocation2 + $0xc0] ss:$16 sps:$4 sm:$0xff]  }
  0x46   :  { %v92_v18 = vadd.f32 %v91_v17, %v85_v15  ;;  %v3285_v44 = vld [vmem:[#allocation2 + $0x2c4] ss:$16 sps:$4 sm:$0xff]   ;;  %v3288_v46 = vld [vmem:[#allocation2 + $0x2c0] ss:$16 sps:$4 sm:$0xff]  }
  0x47   :  { %1805 = vmatpush1.bf16.msra.mxu1 %v3269_v33  ;;  %v3289_v47 = vld [vmem:[#allocation2 + $0xe4] ss:$16 sps:$4 sm:$0xff]   ;;  %v3293_v49 = vld [vmem:[#allocation2 + $0xe0] ss:$16 sps:$4 sm:$0xff]  }
  0x48   :  { %93 = vadd.xlane.f32.xlu0 %v92_v18  ;;  %1846 = vmatpush1.bf16.msra.mxu0 %v3270_v34  ;;  %v3291_v48 = vld [vmem:[#allocation2 + $0x2e4] ss:$16 sps:$4 sm:$0xff]   ;;  %v3294_v50 = vld [vmem:[#allocation2 + $0x2e0] ss:$16 sps:$4 sm:$0xff]  }
  0x49   :  { %1806 = vmatprep.subr.bf16.mxu1 %v3271_v35  ;;  %1847 = vmatprep.subr.bf16.mxu0 %v3273_v36  ;;  %v3295_v51 = vld [vmem:[#allocation2 + $0x104] ss:$16 sps:$4 sm:$0xff]   ;;  %v3299_v53 = vld [vmem:[#allocation2 + $0x100] ss:$16 sps:$4 sm:$0xff]  }
  0x4a   :  { %v3297_v52 = vld [vmem:[#allocation2 + $0x304] ss:$16 sps:$4 sm:$0xff]   ;;  %v3300_v54 = vld [vmem:[#allocation2 + $0x300] ss:$16 sps:$4 sm:$0xff]  }
  0x4b   :  { %1807 = vmatpush1.bf16.msra.mxu1 %v3275_v37  ;;  %v3301_v55 = vld [vmem:[#allocation2 + $0x124] ss:$16 sps:$4 sm:$0xff]   ;;  %v3305_v57 = vld [vmem:[#allocation2 + $0x120] ss:$16 sps:$4 sm:$0xff]  }
  0x4c   :  { %1848 = vmatpush1.bf16.msra.mxu0 %v3276_v38  ;;  %1808 = vmatprep.subr.bf16.mxu1 %v3277_v39  ;;  %v3303_v56 = vld [vmem:[#allocation2 + $0x324] ss:$16 sps:$4 sm:$0xff]   ;;  %v3306_v58 = vld [vmem:[#allocation2 + $0x320] ss:$16 sps:$4 sm:$0xff]   ;;  %v134_v38 = vlaneseq }
  0x4d   :  { %1849 = vmatprep.subr.bf16.mxu0 %v3279_v40  ;;  %v3307_v59 = vld [vmem:[#allocation2 + $0x144] ss:$16 sps:$4 sm:$0xff]   ;;  %v3311_v24 = vld [vmem:[#allocation2 + $0x140] ss:$16 sps:$4 sm:$0xff]  }
  0x4e   :  { %v3309_v60 = vld [vmem:[#allocation2 + $0x344] ss:$16 sps:$4 sm:$0xff]   ;;  %v3312_v25 = vld [vmem:[#allocation2 + $0x340] ss:$16 sps:$4 sm:$0xff]   ;;  %v135_v39 = vshrl.u32 %v134_v38, 7 }
  0x4f   :  { %1809 = vmatpush1.bf16.msra.mxu1 %v3281_v41  ;;  %v3313_v8 = vld [vmem:[#allocation2 + $0x164] ss:$16 sps:$4 sm:$0xff]   ;;  %v3317_v26 = vld [vmem:[#allocation2 + $0x160] ss:$16 sps:$4 sm:$0xff]  }
  0x50   :  { %1850 = vmatpush1.bf16.msra.mxu0 %v3282_v42  ;;  %1810 = vmatprep.subr.bf16.mxu1 %v3283_v43  ;;  %v3318_v27 = vld [vmem:[#allocation2 + $0x360] ss:$16 sps:$4 sm:$0xff]   ;;  %v3319_v28 = vld [vmem:[#allocation2 + $0x184] ss:$16 sps:$4 sm:$0xff]  }
  0x51   :  { %1851 = vmatprep.subr.bf16.mxu0 %v3285_v44  ;;  %v3321_v29 = vld [vmem:[#allocation2 + $0x384] ss:$16 sps:$4 sm:$0xff]   ;;  %v3323_v30 = vld [vmem:[#allocation2 + $0x180] ss:$16 sps:$4 sm:$0xff]  }
  0x52   :  { %v3324_v31 = vld [vmem:[#allocation2 + $0x380] ss:$16 sps:$4 sm:$0xff]   ;;  %v3325_v32 = vld [vmem:[#allocation2 + $0x1a4] ss:$16 sps:$4 sm:$0xff]  }
  0x53   :  { %1811 = vmatpush1.bf16.msra.mxu1 %v3287_v45  ;;  %v3327_v33 = vld [vmem:[#allocation2 + $0x3a4] ss:$16 sps:$4 sm:$0xff]   ;;  %v3329_v34 = vld [vmem:[#allocation2 + $0x1a0] ss:$16 sps:$4 sm:$0xff]   ;;  %v152_v45 = vsub.s32 4, %v135_v39 }
  0x54   :  { %1852 = vmatpush1.bf16.msra.mxu0 %v3288_v46  ;;  %1812 = vmatprep.subr.bf16.mxu1 %v3289_v47  ;;  %v3330_v35 = vld [vmem:[#allocation2 + $0x3a0] ss:$16 sps:$4 sm:$0xff]   ;;  %v3331_v36 = vld [vmem:[#allocation2 + $0x1c4] ss:$16 sps:$4 sm:$0xff]   ;;  %v164_v46 = vsub.s32 7, %v135_v39  ;;  %v160_v47 = vsub.s32 6, %v135_v39 }
  0x55   :  { %1853 = vmatprep.subr.bf16.mxu0 %v3291_v48  ;;  %v3333_v37 = vld [vmem:[#allocation2 + $0x3c4] ss:$16 sps:$4 sm:$0xff]   ;;  %v3335_v40 = vld [vmem:[#allocation2 + $0x1c0] ss:$16 sps:$4 sm:$0xff]  }
  0x56   :  { %v3336_v41 = vld [vmem:[#allocation2 + $0x3c0] ss:$16 sps:$4 sm:$0xff]   ;;  %v3337_v42 = vld [vmem:[#allocation2 + $0x1e4] ss:$16 sps:$4 sm:$0xff]  }
  0x57   :  { %1813 = vmatpush1.bf16.msra.mxu1 %v3293_v49  ;;  %v3339_v43 = vld [vmem:[#allocation2 + $0x3e4] ss:$16 sps:$4 sm:$0xff]   ;;  %v3341_v48 = vld [vmem:[#allocation2 + $0x1e0] ss:$16 sps:$4 sm:$0xff]  }
  0x58   :  { %1854 = vmatpush1.bf16.msra.mxu0 %v3294_v50  ;;  %1814 = vmatprep.subr.bf16.mxu1 %v3295_v51  ;;  %v132_v44 = vld [vmem:[%s4115_s1] sm:$0xff] }
  0x59   :  { %1855 = vmatprep.subr.bf16.mxu0 %v3297_v52  ;;  %v3342_v49 = vld [vmem:[#allocation2 + $0x3e0] ss:$16 sps:$4 sm:$0xff]   ;;  %v153_v51 = vrot.slane %v132_v44, %v152_v45  ;;  %v165_v52 = vrot.slane %v132_v44, %v164_v46 }
  0x5a   :  { %v182_v50 = vld [vmem:[%s4116_s2] sm:$0xff] }
  0x5b   :  { %1815 = vmatpush1.bf16.msra.mxu1 %v3299_v53  ;;  %v203_v53 = vrot.slane %v182_v50, %v152_v45  ;;  %v3354_v45 = vld [vmem:[#allocation2 + $0x2c] ss:$16 sps:$4 sm:$0xff]  }
  0x5c   :  { %1856 = vmatpush1.bf16.msra.mxu0 %v3300_v54  ;;  %1816 = vmatprep.subr.bf16.mxu1 %v3301_v55  ;;  %v215_v54 = vrot.slane %v182_v50, %v164_v46  ;;  %v161_v55 = vrot.slane %v132_v44, %v160_v47 }
  0x5d   :  { %1857 = vmatprep.subr.bf16.mxu0 %v3303_v56  ;;  %v211_v56 = vrot.slane %v182_v50, %v160_v47  ;;  %v3349_v47 = vld [vmem:[#allocation2 + $0x420] ss:$16 sps:$4 sm:$0xff]  }
  0x5f   :  { %1817 = vmatpush1.bf16.msra.mxu1 %v3305_v57  ;;  %v3345_v57 = vld [vmem:[#allocation2 + $0x404] ss:$16 sps:$4 sm:$0xff]  }
  0x60   :  { %1858 = vmatpush1.bf16.msra.mxu0 %v3306_v58  ;;  %1818 = vmatprep.subr.bf16.mxu1 %v3307_v59  ;;  %v3348_v58 = vld [vmem:[#allocation2 + $0xc] ss:$16 sps:$4 sm:$0xff]  }
  0x61   :  { %1859 = vmatprep.subr.bf16.mxu0 %v3309_v60 }
  0x63   :  { %1819 = vmatpush1.bf16.msra.mxu1 %v3311_v24 }
  0x64   :  { %1860 = vmatpush1.bf16.msra.mxu0 %v3312_v25  ;;  %1820 = vmatprep.subr.bf16.mxu1 %v3313_v8 }
  0x67   :  { %1821 = vmatpush1.bf16.msra.mxu1 %v3317_v26 }
  0x68   :  { %1822 = vmatprep.subr.bf16.mxu1 %v3319_v28 }
  0x6b   :  { %1823 = vmatpush1.bf16.msra.mxu1 %v3323_v30 }
  0x6c   :  { %1824 = vmatprep.subr.bf16.mxu1 %v3325_v32 }
  0x6f   :  { %1825 = vmatpush1.bf16.msra.mxu1 %v3329_v34 }
  0x70   :  { %1826 = vmatprep.subr.bf16.mxu1 %v3331_v36 }
  0x73   :  { %1827 = vmatpush1.bf16.msra.mxu1 %v3335_v40  ;;  %v3343_v40 = vld [vmem:[#allocation2 + $0x400] ss:$16 sps:$4 sm:$0xff]  }
  0x74   :  { %1828 = vmatprep.subr.bf16.mxu1 %v3337_v42 }
  0x77   :  { %1829 = vmatpush1.bf16.msra.mxu1 %v3341_v48  ;;  %v3352_v48 = vld [vmem:[#allocation2 + $0x28] ss:$16 sps:$4 sm:$0xff]  }
  0x78   :  { %1962 = vmatprep.subr.bf16.mxu1 %v3348_v58  ;;  %v3372_v58 = vld [vmem:[#allocation2 + $0x8c] ss:$16 sps:$4 sm:$0xff]  }
  0xd5   :  { %v94_v61 = vpop.xlane.xlu0 %93 }
  0xd6   :  { %v95_v62 = vmul.f32 0.0009765625, %v94_v61 }
  0xd8   :  { %v3968_v63 = vsub.f32 %v78_v3, %v95_v62  ;;  %v3972_v7 = vsub.f32 %v79_v4, %v95_v62  ;;  %v3976_v10 = vsub.f32 %v80_v5, %v95_v62  ;;  %v3980_v12 = vsub.f32 %v81_v6, %v95_v62 }
  0xd9   :  { %v3988_v3 = vsub.f32 %v82_v9, %v95_v62  ;;  %v3994_v5 = vsub.f32 %v83_v11, %v95_v62  ;;  %v4000_v17 = vsub.f32 %v84_v13, %v95_v62  ;;  %v4006_v19 = vsub.f32 %v85_v15, %v95_v62  ;;  %v3315_v15 = vld [vmem:[#allocation2 + $0x364] ss:$16 sps:$4 sm:$0xff]  }
  0xda   :  { %v104_v14 = vmul.f32 %v3968_v63, %v3968_v63  ;;  %v105_v16 = vmul.f32 %v3972_v7, %v3972_v7  ;;  %v106_v0 = vmul.f32 %v3976_v10, %v3976_v10  ;;  %v107_v1 = vmul.f32 %v3980_v12, %v3980_v12  ;;  %1861 = vmatprep.subr.bf16.mxu0 %v3315_v15 }
  0xdb   :  { %v108_v9 = vmul.f32 %v3988_v3, %v3988_v3  ;;  %v109_v2 = vmul.f32 %v3994_v5, %v3994_v5  ;;  %v110_v20 = vmul.f32 %v4000_v17, %v4000_v17  ;;  %v111_v13 = vmul.f32 %v4006_v19, %v4006_v19  ;;  %1862 = vmatpush1.bf16.msra.mxu0 %v3318_v27 }
  0xdc   :  { %v112_v4 = vadd.f32 %v105_v16, %v104_v14  ;;  %1863 = vmatprep.subr.bf16.mxu0 %v3321_v29  ;;  %v4020_v62 = vsub.s32 1, %v135_v39  ;;  %v4022_v14 = vsub.s32 3, %v135_v39  ;;  %v4024_v16 = vsub.s32 0, %v135_v39 }
  0xde   :  { %v113_v6 = vadd.f32 %v112_v4, %v106_v0  ;;  %v4026_v0 = vsub.s32 2, %v135_v39  ;;  %v156_v4 = vsub.s32 5, %v135_v39 }
  0xdf   :  { %1864 = vmatpush1.bf16.msra.mxu0 %v3324_v31 }
  0xe0   :  { %v114_v18 = vadd.f32 %v113_v6, %v107_v1  ;;  %1865 = vmatprep.subr.bf16.mxu0 %v3327_v33  ;;  %v141_v1 = vrot.slane %v132_v44, %v4020_v62  ;;  %v149_v6 = vrot.slane %v132_v44, %v4022_v14 }
  0xe2   :  { %v115_v11 = vadd.f32 %v114_v18, %v108_v9  ;;  %v191_v9 = vrot.slane %v182_v50, %v4020_v62  ;;  %v137_v18 = vrot.slane %v132_v44, %v4024_v16 }
  0xe3   :  { %1866 = vmatpush1.bf16.msra.mxu0 %v3330_v35 }
  0xe4   :  { %v116_v21 = vadd.f32 %v115_v11, %v109_v2  ;;  %1867 = vmatprep.subr.bf16.mxu0 %v3333_v37  ;;  %v145_v2 = vrot.slane %v132_v44, %v4026_v0  ;;  %v157_v11 = vrot.slane %v132_v44, %v156_v4  ;;  %v3351_v44 = vld [vmem:[#allocation2 + $0x424] ss:$16 sps:$4 sm:$0xff]  }
  0xe6   :  { %v117_v22 = vadd.f32 %v116_v21, %v110_v20  ;;  %v199_v21 = vrot.slane %v182_v50, %v4022_v14 }
  0xe7   :  { %1868 = vmatpush1.bf16.msra.mxu0 %v3336_v41  ;;  %v3346_v41 = vld [vmem:[#allocation2 + $0x8] ss:$16 sps:$4 sm:$0xff]  }
  0xe8   :  { %v118_v23 = vadd.f32 %v117_v22, %v111_v13  ;;  %1869 = vmatprep.subr.bf16.mxu0 %v3339_v43  ;;  %v187_v13 = vrot.slane %v182_v50, %v4024_v16  ;;  %v195_v22 = vrot.slane %v182_v50, %v4026_v0 }
  0xea   :  { %119 = vadd.xlane.f32.xlu0 %v118_v23  ;;  %v207_v23 = vrot.slane %v182_v50, %v156_v4  ;;  %v3360_v50 = vld [vmem:[#allocation2 + $0x4c] ss:$16 sps:$4 sm:$0xff]  }
  0xeb   :  { %1870 = vmatpush1.bf16.msra.mxu0 %v3342_v49  ;;  %v3357_v49 = vld [vmem:[#allocation2 + $0x444] ss:$16 sps:$4 sm:$0xff]   ;;  %v3378_v4 = vld [vmem:[#allocation2 + $0xac] ss:$16 sps:$4 sm:$0xff]  }
  0xec   :  { %1880 = vmatprep.subr.bf16.mxu0 %v3345_v57  ;;  %v3369_v57 = vld [vmem:[#allocation2 + $0x484] ss:$16 sps:$4 sm:$0xff]  }
 0x177   :  { %v120_v59 = vpop.xlane.xlu0 %119 }
 0x178   :  { %v121_v60 = vmul.f32 0.0009765625, %v120_v59  ;;  %v3367_v59 = vld [vmem:[#allocation2 + $0x480] ss:$16 sps:$4 sm:$0xff]  }
 0x17a   :  { %v122_v61 = vadd.f32 1e-05, %v121_v60  ;;  %v3370_v60 = vld [vmem:[#allocation2 + $0x88] ss:$16 sps:$4 sm:$0xff]  }
 0x17c   :  { %3743 = vrsqrt.f32 %v122_v61  ;;  %v3375_v61 = vld [vmem:[#allocation2 + $0x4a4] ss:$16 sps:$4 sm:$0xff]  }
 0x186   :  { %v3744_v20 = vpop.eup %3743 }
 0x187   :  { %v125_v24 = vmul.f32 %v3744_v20, %v3972_v7  ;;  %v127_v25 = vmul.f32 %v3744_v20, %v3980_v12  ;;  %v124_v8 = vmul.f32 %v3744_v20, %v3968_v63  ;;  %v126_v15 = vmul.f32 %v3744_v20, %v3976_v10 }
 0x188   :  { %v129_v26 = vmul.f32 %v3744_v20, %v3994_v5  ;;  %v128_v27 = vmul.f32 %v3744_v20, %v3988_v3  ;;  %v131_v28 = vmul.f32 %v3744_v20, %v4006_v19  ;;  %v130_v29 = vmul.f32 %v3744_v20, %v4000_v17  ;;  %v3387_v20 = vld [vmem:[#allocation2 + $0x4e4] ss:$16 sps:$4 sm:$0xff]  }
 0x189   :  { %v175_v30 = vmul.f32 %v141_v1, %v125_v24  ;;  %v177_v31 = vmul.f32 %v149_v6, %v127_v25  ;;  %v174_v32 = vmul.f32 %v137_v18, %v124_v8  ;;  %v176_v33 = vmul.f32 %v145_v2, %v126_v15  ;;  %v3373_v1 = vld [vmem:[#allocation2 + $0x4a0] ss:$16 sps:$4 sm:$0xff]   ;;  %v3376_v6 = vld [vmem:[#allocation2 + $0xa8] ss:$16 sps:$4 sm:$0xff]   ;;  %v3384_v18 = vld [vmem:[#allocation2 + $0xcc] ss:$16 sps:$4 sm:$0xff]  }
 0x18a   :  { %v179_v34 = vmul.f32 %v157_v11, %v129_v26  ;;  %v178_v7 = vmul.f32 %v153_v51, %v128_v27  ;;  %v181_v35 = vmul.f32 %v165_v52, %v131_v28  ;;  %v180_v12 = vmul.f32 %v161_v55, %v130_v29  ;;  %v3355_v51 = vld [vmem:[#allocation2 + $0x440] ss:$16 sps:$4 sm:$0xff]   ;;  %v3358_v52 = vld [vmem:[#allocation2 + $0x48] ss:$16 sps:$4 sm:$0xff]   ;;  %v3396_v24 = vld [vmem:[#allocation2 + $0x10c] ss:$16 sps:$4 sm:$0xff]  }
 0x18b   :  { %v225_v36 = vadd.f32 %v191_v9, %v175_v30  ;;  %v227_v63 = vadd.f32 %v199_v21, %v177_v31  ;;  %v224_v37 = vadd.f32 %v187_v13, %v174_v32  ;;  %v226_v10 = vadd.f32 %v195_v22, %v176_v33  ;;  %v3361_v55 = vld [vmem:[#allocation2 + $0x460] ss:$16 sps:$4 sm:$0xff]   ;;  %v3381_v9 = vld [vmem:[#allocation2 + $0x4c4] ss:$16 sps:$4 sm:$0xff]   ;;  %v3382_v11 = vld [vmem:[#allocation2 + $0xc8] ss:$16 sps:$4 sm:$0xff]  }
 0x18c   :  { %v229_v38 = vadd.f32 %v207_v23, %v179_v34  ;;  %v4044_v5 = vadd.f32 %v203_v53, %v178_v7  ;;  %v4046_v3 = vadd.f32 %v215_v54, %v181_v35  ;;  %v4048_v19 = vadd.f32 %v211_v56, %v180_v12  ;;  %v3363_v53 = vld [vmem:[#allocation2 + $0x464] ss:$16 sps:$4 sm:$0xff]   ;;  %v3366_v54 = vld [vmem:[#allocation2 + $0x6c] ss:$16 sps:$4 sm:$0xff]   ;;  %v3364_v56 = vld [vmem:[#allocation2 + $0x68] ss:$16 sps:$4 sm:$0xff]  }
 0x18d   :  { %v233_v17 = vpack.c.bf16 %v225_v36, %v225_v36  ;;  %v4050_v39 = vpack.c.bf16 %v227_v63, %v227_v63  ;;  %v4052_v42 = vpack.c.bf16 %v224_v37, %v224_v37  ;;  %v4054_v43 = vpack.c.bf16 %v226_v10, %v226_v10  ;;  %v3379_v2 = vld [vmem:[#allocation2 + $0x4c0] ss:$16 sps:$4 sm:$0xff]   ;;  %v3390_v21 = vld [vmem:[#allocation2 + $0xec] ss:$16 sps:$4 sm:$0xff]   ;;  %v3388_v22 = vld [vmem:[#allocation2 + $0xe8] ss:$16 sps:$4 sm:$0xff]  }
 0x18e   :  { %v4059_v46 = vpack.c.bf16 %v229_v38, %v229_v38  ;;  %v3385_v13 = vld [vmem:[#allocation2 + $0x4e0] ss:$16 sps:$4 sm:$0xff]   ;;  %v3393_v23 = vld [vmem:[#allocation2 + $0x504] ss:$16 sps:$4 sm:$0xff]   ;;  %v3394_v8 = vld [vmem:[#allocation2 + $0x108] ss:$16 sps:$4 sm:$0xff]  }
 0x18f   :  { %1830 = vmatprep.mubr.bf16.mxu1 %v233_v17  ;;  %1871 = vmatprep.mubr.bf16.mxu0 %v4050_v39  ;;  %v3391_v25 = vld [vmem:[#allocation2 + $0x500] ss:$16 sps:$4 sm:$0xff]   ;;  %v3399_v15 = vld [vmem:[#allocation2 + $0x524] ss:$16 sps:$4 sm:$0xff]   ;;  %v3402_v26 = vld [vmem:[#allocation2 + $0x12c] ss:$16 sps:$4 sm:$0xff]  }
 0x190   :  { %1831 = vmatmul.mubr.bf16.vlgmr.msra.gmra.mrb[0].mxu1 %v4052_v42  ;;  %1872 = vmatmul.mubr.bf16.vlgmr.msra.gmra.mrb[0].mxu0 %v4054_v43  ;;  %v3397_v27 = vld [vmem:[#allocation2 + $0x520] ss:$16 sps:$4 sm:$0xff]   ;;  %v3400_v28 = vld [vmem:[#allocation2 + $0x128] ss:$16 sps:$4 sm:$0xff]   ;;  %v3405_v29 = vld [vmem:[#allocation2 + $0x544] ss:$16 sps:$4 sm:$0xff]  }
 0x191   :  { %1881 = vmatpush1.bf16.msra.mxu0 %v3343_v40  ;;  %1963 = vmatpush1.bf16.msra.mxu1 %v3346_v41  ;;  %v3408_v30 = vld [vmem:[#allocation2 + $0x14c] ss:$16 sps:$4 sm:$0xff]   ;;  %v3403_v31 = vld [vmem:[#allocation2 + $0x540] ss:$16 sps:$4 sm:$0xff]   ;;  %v3406_v32 = vld [vmem:[#allocation2 + $0x148] ss:$16 sps:$4 sm:$0xff]  }
 0x192   :  { %1912 = vmatprep.mubr.bf16.mxu0 %v4059_v46  ;;  %1994 = vmatprep.mubr.bf16.mxu1 %v233_v17  ;;  %v3411_v33 = vld [vmem:[#allocation2 + $0x564] ss:$16 sps:$4 sm:$0xff]   ;;  %v3414_v34 = vld [vmem:[#allocation2 + $0x16c] ss:$16 sps:$4 sm:$0xff]   ;;  %v3409_v7 = vld [vmem:[#allocation2 + $0x560] ss:$16 sps:$4 sm:$0xff]  }
 0x193   :  { %1882 = vmatprep.subr.bf16.mxu0 %v3351_v44  ;;  %1964 = vmatprep.subr.bf16.mxu1 %v3354_v45  ;;  %v3412_v35 = vld [vmem:[#allocation2 + $0x168] ss:$16 sps:$4 sm:$0xff]   ;;  %v3417_v12 = vld [vmem:[#allocation2 + $0x584] ss:$16 sps:$4 sm:$0xff]   ;;  %v3420_v36 = vld [vmem:[#allocation2 + $0x18c] ss:$16 sps:$4 sm:$0xff]  }
 0x194   :  { %v3415_v63 = vld [vmem:[#allocation2 + $0x580] ss:$16 sps:$4 sm:$0xff]   ;;  %v3418_v37 = vld [vmem:[#allocation2 + $0x188] ss:$16 sps:$4 sm:$0xff]   ;;  %v3423_v10 = vld [vmem:[#allocation2 + $0x5a4] ss:$16 sps:$4 sm:$0xff]  }
 0x195   :  { %1883 = vmatpush1.bf16.msra.mxu0 %v3349_v47  ;;  %1965 = vmatpush1.bf16.msra.mxu1 %v3352_v48  ;;  %v3426_v38 = vld [vmem:[#allocation2 + $0x1ac] ss:$16 sps:$4 sm:$0xff]   ;;  %v3421_v17 = vld [vmem:[#allocation2 + $0x5a0] ss:$16 sps:$4 sm:$0xff]   ;;  %v3424_v40 = vld [vmem:[#allocation2 + $0x1a8] ss:$16 sps:$4 sm:$0xff]  }
 0x196   :  { %1884 = vmatprep.subr.bf16.mxu0 %v3357_v49  ;;  %1966 = vmatprep.subr.bf16.mxu1 %v3360_v50  ;;  %v3429_v41 = vld [vmem:[#allocation2 + $0x5c4] ss:$16 sps:$4 sm:$0xff]   ;;  %v3432_v44 = vld [vmem:[#allocation2 + $0x1cc] ss:$16 sps:$4 sm:$0xff]   ;;  %v3427_v45 = vld [vmem:[#allocation2 + $0x5c0] ss:$16 sps:$4 sm:$0xff]  }
 0x197   :  { %v3430_v47 = vld [vmem:[#allocation2 + $0x1c8] ss:$16 sps:$4 sm:$0xff]   ;;  %v3435_v48 = vld [vmem:[#allocation2 + $0x5e4] ss:$16 sps:$4 sm:$0xff]   ;;  %v3438_v49 = vld [vmem:[#allocation2 + $0x1ec] ss:$16 sps:$4 sm:$0xff]  }
 0x198   :  { %v3433_v50 = vld [vmem:[#allocation2 + $0x5e0] ss:$16 sps:$4 sm:$0xff]  }
 0x199   :  { %1885 = vmatpush1.bf16.msra.mxu0 %v3355_v51  ;;  %1967 = vmatpush1.bf16.msra.mxu1 %v3358_v52  ;;  %v3436_v51 = vld [vmem:[#allocation2 + $0x1e8] ss:$16 sps:$4 sm:$0xff]   ;;  %v3441_v52 = vld [vmem:[#allocation2 + $0x604] ss:$16 sps:$4 sm:$0xff]  }
 0x19a   :  { %1886 = vmatprep.subr.bf16.mxu0 %v3363_v53  ;;  %1968 = vmatprep.subr.bf16.mxu1 %v3366_v54  ;;  %v3444_v53 = vld [vmem:[#allocation2 + $0x20c] ss:$16 sps:$4 sm:$0xff]   ;;  %v3439_v54 = vld [vmem:[#allocation2 + $0x600] ss:$16 sps:$4 sm:$0xff]  }
 0x19d   :  { %1887 = vmatpush1.bf16.msra.mxu0 %v3361_v55  ;;  %1969 = vmatpush1.bf16.msra.mxu1 %v3364_v56  ;;  %v4064_v55 = vpack.c.bf16 %v4044_v5, %v4044_v5  ;;  %v3442_v56 = vld [vmem:[#allocation2 + $0x208] ss:$16 sps:$4 sm:$0xff]  }
 0x19e   :  { %1888 = vmatprep.subr.bf16.mxu0 %v3369_v57  ;;  %1970 = vmatprep.subr.bf16.mxu1 %v3372_v58  ;;  %v4068_v57 = vpack.c.bf16 %v4046_v3, %v4046_v3  ;;  %v3447_v58 = vld [vmem:[#allocation2 + $0x624] ss:$16 sps:$4 sm:$0xff]   ;;  %v3448_v5 = vld [vmem:[#allocation2 + $0x228] ss:$16 sps:$4 sm:$0xff]   ;;  %v3451_v3 = vld [vmem:[#allocation2 + $0x640] ss:$16 sps:$4 sm:$0xff]  }
 0x1a1   :  { %1889 = vmatpush1.bf16.msra.mxu0 %v3367_v59  ;;  %1971 = vmatpush1.bf16.msra.mxu1 %v3370_v60  ;;  %v3450_v59 = vld [vmem:[#allocation2 + $0x22c] ss:$16 sps:$4 sm:$0xff]   ;;  %v3445_v60 = vld [vmem:[#allocation2 + $0x620] ss:$16 sps:$4 sm:$0xff]  }
 0x1a2   :  { %1890 = vmatprep.subr.bf16.mxu0 %v3375_v61  ;;  %1972 = vmatprep.subr.bf16.mxu1 %v3378_v4  ;;  %v3453_v61 = vld [vmem:[#allocation2 + $0x644] ss:$16 sps:$4 sm:$0xff]   ;;  %v3456_v4 = vld [vmem:[#allocation2 + $0x24c] ss:$16 sps:$4 sm:$0xff]  }
 0x1a5   :  { %1891 = vmatpush1.bf16.msra.mxu0 %v3373_v1  ;;  %1973 = vmatpush1.bf16.msra.mxu1 %v3376_v6  ;;  %v3454_v1 = vld [vmem:[#allocation2 + $0x248] ss:$16 sps:$4 sm:$0xff]   ;;  %v3459_v6 = vld [vmem:[#allocation2 + $0x664] ss:$16 sps:$4 sm:$0xff]  }
 0x1a6   :  { %1892 = vmatprep.subr.bf16.mxu0 %v3381_v9  ;;  %1974 = vmatprep.subr.bf16.mxu1 %v3384_v18  ;;  %v3457_v9 = vld [vmem:[#allocation2 + $0x660] ss:$16 sps:$4 sm:$0xff]   ;;  %v3460_v18 = vld [vmem:[#allocation2 + $0x268] ss:$16 sps:$4 sm:$0xff]  }
 0x1a9   :  { %1893 = vmatpush1.bf16.msra.mxu0 %v3379_v2  ;;  %1975 = vmatpush1.bf16.msra.mxu1 %v3382_v11  ;;  %v3465_v2 = vld [vmem:[#allocation2 + $0x684] ss:$16 sps:$4 sm:$0xff]   ;;  %v3463_v11 = vld [vmem:[#allocation2 + $0x680] ss:$16 sps:$4 sm:$0xff]  }
 0x1aa   :  { %1894 = vmatprep.subr.bf16.mxu0 %v3387_v20  ;;  %1976 = vmatprep.subr.bf16.mxu1 %v3390_v21  ;;  %v3466_v20 = vld [vmem:[#allocation2 + $0x288] ss:$16 sps:$4 sm:$0xff]   ;;  %v3471_v21 = vld [vmem:[#allocation2 + $0x6a4] ss:$16 sps:$4 sm:$0xff]  }
 0x1ad   :  { %1895 = vmatpush1.bf16.msra.mxu0 %v3385_v13  ;;  %1977 = vmatpush1.bf16.msra.mxu1 %v3388_v22  ;;  %v3474_v13 = vld [vmem:[#allocation2 + $0x2ac] ss:$16 sps:$4 sm:$0xff]   ;;  %v3469_v22 = vld [vmem:[#allocation2 + $0x6a0] ss:$16 sps:$4 sm:$0xff]  }
 0x1ae   :  { %1896 = vmatprep.subr.bf16.mxu0 %v3393_v23  ;;  %1978 = vmatprep.subr.bf16.mxu1 %v3396_v24  ;;  %v3472_v23 = vld [vmem:[#allocation2 + $0x2a8] ss:$16 sps:$4 sm:$0xff]   ;;  %v3477_v24 = vld [vmem:[#allocation2 + $0x6c4] ss:$16 sps:$4 sm:$0xff]  }
 0x1b1   :  { %1897 = vmatpush1.bf16.msra.mxu0 %v3391_v25  ;;  %1979 = vmatpush1.bf16.msra.mxu1 %v3394_v8  ;;  %v3480_v25 = vld [vmem:[#allocation2 + $0x2cc] ss:$16 sps:$4 sm:$0xff]   ;;  %v3475_v8 = vld [vmem:[#allocation2 + $0x6c0] ss:$16 sps:$4 sm:$0xff]  }
 0x1b2   :  { %1898 = vmatprep.subr.bf16.mxu0 %v3399_v15  ;;  %1980 = vmatprep.subr.bf16.mxu1 %v3402_v26  ;;  %v3478_v15 = vld [vmem:[#allocation2 + $0x2c8] ss:$16 sps:$4 sm:$0xff]   ;;  %v3483_v26 = vld [vmem:[#allocation2 + $0x6e4] ss:$16 sps:$4 sm:$0xff]  }
 0x1b5   :  { %1899 = vmatpush1.bf16.msra.mxu0 %v3397_v27  ;;  %1981 = vmatpush1.bf16.msra.mxu1 %v3400_v28  ;;  %v3486_v27 = vld [vmem:[#allocation2 + $0x2ec] ss:$16 sps:$4 sm:$0xff]   ;;  %v3481_v28 = vld [vmem:[#allocation2 + $0x6e0] ss:$16 sps:$4 sm:$0xff]  }
 0x1b6   :  { %1900 = vmatprep.subr.bf16.mxu0 %v3405_v29  ;;  %1982 = vmatprep.subr.bf16.mxu1 %v3408_v30  ;;  %v3484_v29 = vld [vmem:[#allocation2 + $0x2e8] ss:$16 sps:$4 sm:$0xff]   ;;  %v3489_v30 = vld [vmem:[#allocation2 + $0x704] ss:$16 sps:$4 sm:$0xff]  }
 0x1b9   :  { %1901 = vmatpush1.bf16.msra.mxu0 %v3403_v31  ;;  %1983 = vmatpush1.bf16.msra.mxu1 %v3406_v32  ;;  %v3492_v31 = vld [vmem:[#allocation2 + $0x30c] ss:$16 sps:$4 sm:$0xff]   ;;  %v3487_v32 = vld [vmem:[#allocation2 + $0x700] ss:$16 sps:$4 sm:$0xff]  }
 0x1ba   :  { %1902 = vmatprep.subr.bf16.mxu0 %v3411_v33  ;;  %1984 = vmatprep.subr.bf16.mxu1 %v3414_v34  ;;  %v3490_v33 = vld [vmem:[#allocation2 + $0x308] ss:$16 sps:$4 sm:$0xff]   ;;  %v3495_v34 = vld [vmem:[#allocation2 + $0x724] ss:$16 sps:$4 sm:$0xff]  }
 0x1bd   :  { %1903 = vmatpush1.bf16.msra.mxu0 %v3409_v7  ;;  %1985 = vmatpush1.bf16.msra.mxu1 %v3412_v35  ;;  %v3498_v7 = vld [vmem:[#allocation2 + $0x32c] ss:$16 sps:$4 sm:$0xff]   ;;  %v3493_v35 = vld [vmem:[#allocation2 + $0x720] ss:$16 sps:$4 sm:$0xff]  }
 0x1be   :  { %1904 = vmatprep.subr.bf16.mxu0 %v3417_v12  ;;  %1986 = vmatprep.subr.bf16.mxu1 %v3420_v36  ;;  %v3496_v12 = vld [vmem:[#allocation2 + $0x328] ss:$16 sps:$4 sm:$0xff]   ;;  %v3501_v36 = vld [vmem:[#allocation2 + $0x744] ss:$16 sps:$4 sm:$0xff]  }
 0x1c1   :  { %1905 = vmatpush1.bf16.msra.mxu0 %v3415_v63  ;;  %1987 = vmatpush1.bf16.msra.mxu1 %v3418_v37  ;;  %v3504_v63 = vld [vmem:[#allocation2 + $0x34c] ss:$16 sps:$4 sm:$0xff]   ;;  %v3499_v37 = vld [vmem:[#allocation2 + $0x740] ss:$16 sps:$4 sm:$0xff]  }
 0x1c2   :  { %1906 = vmatprep.subr.bf16.mxu0 %v3423_v10  ;;  %1988 = vmatprep.subr.bf16.mxu1 %v3426_v38  ;;  %v3502_v10 = vld [vmem:[#allocation2 + $0x348] ss:$16 sps:$4 sm:$0xff]   ;;  %v3507_v38 = vld [vmem:[#allocation2 + $0x764] ss:$16 sps:$4 sm:$0xff]  }
 0x1c5   :  { %1907 = vmatpush1.bf16.msra.mxu0 %v3421_v17  ;;  %1989 = vmatpush1.bf16.msra.mxu1 %v3424_v40  ;;  %v3510_v17 = vld [vmem:[#allocation2 + $0x36c] ss:$16 sps:$4 sm:$0xff]   ;;  %v3505_v40 = vld [vmem:[#allocation2 + $0x760] ss:$16 sps:$4 sm:$0xff]  }
 0x1c6   :  { %1908 = vmatprep.subr.bf16.mxu0 %v3429_v41  ;;  %1990 = vmatprep.subr.bf16.mxu1 %v3432_v44  ;;  %v3508_v41 = vld [vmem:[#allocation2 + $0x368] ss:$16 sps:$4 sm:$0xff]   ;;  %v3513_v44 = vld [vmem:[#allocation2 + $0x784] ss:$16 sps:$4 sm:$0xff]  }
 0x1c9   :  { %1909 = vmatpush1.bf16.msra.mxu0 %v3427_v45  ;;  %1991 = vmatpush1.bf16.msra.mxu1 %v3430_v47  ;;  %v3516_v45 = vld [vmem:[#allocation2 + $0x38c] ss:$16 sps:$4 sm:$0xff]   ;;  %v3511_v47 = vld [vmem:[#allocation2 + $0x780] ss:$16 sps:$4 sm:$0xff]  }
 0x1ca   :  { %1910 = vmatprep.subr.bf16.mxu0 %v3435_v48  ;;  %1992 = vmatprep.subr.bf16.mxu1 %v3438_v49  ;;  %v3514_v48 = vld [vmem:[#allocation2 + $0x388] ss:$16 sps:$4 sm:$0xff]   ;;  %v3519_v49 = vld [vmem:[#allocation2 + $0x7a4] ss:$16 sps:$4 sm:$0xff]  }
 0x1cd   :  { %1911 = vmatpush1.bf16.msra.mxu0 %v3433_v50  ;;  %1993 = vmatpush1.bf16.msra.mxu1 %v3436_v51  ;;  %v3522_v50 = vld [vmem:[#allocation2 + $0x3ac] ss:$16 sps:$4 sm:$0xff]   ;;  %v3517_v51 = vld [vmem:[#allocation2 + $0x7a0] ss:$16 sps:$4 sm:$0xff]  }
 0x1ce   :  { %1921 = vmatprep.subr.bf16.mxu0 %v3441_v52  ;;  %2003 = vmatprep.subr.bf16.mxu1 %v3444_v53  ;;  %v3520_v52 = vld [vmem:[#allocation2 + $0x3a8] ss:$16 sps:$4 sm:$0xff]   ;;  %v3525_v53 = vld [vmem:[#allocation2 + $0x7c4] ss:$16 sps:$4 sm:$0xff]  }
 0x1d0   :  { %1913 = vmatmul.mubr.bf16.vlgmr.msra.gmra.mrb[0].mxu0 %v4064_v55  ;;  %1995 = vmatmul.mubr.bf16.vlgmr.msra.gmra.mrb[4].mxu1 %v4052_v42  ;;  %v3462_v42 = vld [vmem:[#allocation2 + $0x26c] ss:$16 sps:$4 sm:$0xff]  }
 0x1d1   :  { %1922 = vmatpush1.bf16.msra.mxu0 %v3439_v54  ;;  %1953 = vmatprep.mubr.bf16.mxu0 %v4068_v57  ;;  %v3528_v54 = vld [vmem:[#allocation2 + $0x3cc] ss:$16 sps:$4 sm:$0xff]  }
 0x1d2   :  { %2004 = vmatpush1.bf16.msra.mxu1 %v3442_v56  ;;  %2035 = vmatprep.mubr.bf16.mxu1 %v4050_v39  ;;  %v3468_v39 = vld [vmem:[#allocation2 + $0x28c] ss:$16 sps:$4 sm:$0xff]   ;;  %v3523_v56 = vld [vmem:[#allocation2 + $0x7c0] ss:$16 sps:$4 sm:$0xff]  }
 0x1d3   :  { %1923 = vmatprep.subr.bf16.mxu0 %v3447_v58  ;;  %2005 = vmatprep.subr.bf16.mxu1 %v3450_v59  ;;  %v3526_v58 = vld [vmem:[#allocation2 + $0x3c8] ss:$16 sps:$4 sm:$0xff]   ;;  %v3531_v59 = vld [vmem:[#allocation2 + $0x7e4] ss:$16 sps:$4 sm:$0xff]  }
 0x1d5   :  { %1924 = vmatpush1.bf16.msra.mxu0 %v3445_v60  ;;  %v3534_v60 = vld [vmem:[#allocation2 + $0x3ec] ss:$16 sps:$4 sm:$0xff]  }
 0x1d6   :  { %2006 = vmatpush1.bf16.msra.mxu1 %v3448_v5  ;;  %1925 = vmatprep.subr.bf16.mxu0 %v3453_v61  ;;  %v3529_v5 = vld [vmem:[#allocation2 + $0x7e0] ss:$16 sps:$4 sm:$0xff]   ;;  %v3532_v61 = vld [vmem:[#allocation2 + $0x3e8] ss:$16 sps:$4 sm:$0xff]  }
 0x1d7   :  { %2007 = vmatprep.subr.bf16.mxu1 %v3456_v4  ;;  %v3537_v4 = vld [vmem:[#allocation2 + $0x40c] ss:$16 sps:$4 sm:$0xff]  }
 0x1d9   :  { %1926 = vmatpush1.bf16.msra.mxu0 %v3451_v3  ;;  %v4076_v3 = vpack.c.bf16 %v4048_v19, %v4048_v19  ;;  %v3634_v19 = vld [vmem:[#allocation4 + $0x10] ss:$8 sps:$4 sm:$0xff]  }
 0x1da   :  { %2008 = vmatpush1.bf16.msra.mxu1 %v3454_v1  ;;  %1927 = vmatprep.subr.bf16.mxu0 %v3459_v6  ;;  %v3535_v1 = vld [vmem:[#allocation2 + $0x408] ss:$16 sps:$4 sm:$0xff]   ;;  %v3540_v6 = vld [vmem:[#allocation2 + $0x42c] ss:$16 sps:$4 sm:$0xff]  }
 0x1db   :  { %2009 = vmatprep.subr.bf16.mxu1 %v3462_v42  ;;  %v3631_v42 = vld [vmem:[#allocation4] ss:$8 sps:$4 sm:$0xff]  }
 0x1dd   :  { %1928 = vmatpush1.bf16.msra.mxu0 %v3457_v9  ;;  %v3633_v9 = vld [vmem:[#allocation4 + $0x4] ss:$8 sps:$4 sm:$0xff]  }
 0x1de   :  { %2010 = vmatpush1.bf16.msra.mxu1 %v3460_v18  ;;  %1929 = vmatprep.subr.bf16.mxu0 %v3465_v2  ;;  %v3538_v18 = vld [vmem:[#allocation2 + $0x428] ss:$16 sps:$4 sm:$0xff]   ;;  %v3636_v2 = vld [vmem:[#allocation4 + $0x14] ss:$8 sps:$4 sm:$0xff]  }
 0x1df   :  { %2011 = vmatprep.subr.bf16.mxu1 %v3468_v39  ;;  %v3543_v39 = vld [vmem:[#allocation2 + $0x44c] ss:$16 sps:$4 sm:$0xff]  }
 0x1e1   :  { %1930 = vmatpush1.bf16.msra.mxu0 %v3463_v11  ;;  %v3639_v11 = vld [vmem:[#allocation4 + $0x24] ss:$8 sps:$4 sm:$0xff]  }
 0x1e2   :  { %2012 = vmatpush1.bf16.msra.mxu1 %v3466_v20  ;;  %1931 = vmatprep.subr.bf16.mxu0 %v3471_v21  ;;  %v3541_v20 = vld [vmem:[#allocation2 + $0x448] ss:$16 sps:$4 sm:$0xff]   ;;  %v3546_v21 = vld [vmem:[#allocation2 + $0x46c] ss:$16 sps:$4 sm:$0xff]  }
 0x1e3   :  { %2013 = vmatprep.subr.bf16.mxu1 %v3474_v13  ;;  %v3642_v13 = vld [vmem:[#allocation4 + $0x34] ss:$8 sps:$4 sm:$0xff]  }
 0x1e5   :  { %1932 = vmatpush1.bf16.msra.mxu0 %v3469_v22  ;;  %v3544_v22 = vld [vmem:[#allocation2 + $0x468] ss:$16 sps:$4 sm:$0xff]  }
 0x1e6   :  { %2014 = vmatpush1.bf16.msra.mxu1 %v3472_v23  ;;  %1933 = vmatprep.subr.bf16.mxu0 %v3477_v24  ;;  %v3640_v23 = vld [vmem:[#allocation4 + $0x30] ss:$8 sps:$4 sm:$0xff]   ;;  %v3645_v24 = vld [vmem:[#allocation4 + $0x44] ss:$8 sps:$4 sm:$0xff]  }
 0x1e7   :  { %2015 = vmatprep.subr.bf16.mxu1 %v3480_v25  ;;  %v3547_v25 = vld [vmem:[#allocation2 + $0x488] ss:$16 sps:$4 sm:$0xff]  }
 0x1e9   :  { %1934 = vmatpush1.bf16.msra.mxu0 %v3475_v8  ;;  %v3552_v8 = vld [vmem:[#allocation2 + $0x4ac] ss:$16 sps:$4 sm:$0xff]  }
 0x1ea   :  { %2016 = vmatpush1.bf16.msra.mxu1 %v3478_v15  ;;  %1935 = vmatprep.subr.bf16.mxu0 %v3483_v26  ;;  %v3643_v15 = vld [vmem:[#allocation4 + $0x40] ss:$8 sps:$4 sm:$0xff]   ;;  %v3648_v26 = vld [vmem:[#allocation4 + $0x54] ss:$8 sps:$4 sm:$0xff]  }
 0x1eb   :  { %2017 = vmatprep.subr.bf16.mxu1 %v3486_v27  ;;  %v3550_v27 = vld [vmem:[#allocation2 + $0x4a8] ss:$16 sps:$4 sm:$0xff]  }
 0x1ed   :  { %1936 = vmatpush1.bf16.msra.mxu0 %v3481_v28  ;;  %v3555_v28 = vld [vmem:[#allocation2 + $0x4cc] ss:$16 sps:$4 sm:$0xff]  }
 0x1ee   :  { %2018 = vmatpush1.bf16.msra.mxu1 %v3484_v29  ;;  %1937 = vmatprep.subr.bf16.mxu0 %v3489_v30  ;;  %v3646_v29 = vld [vmem:[#allocation4 + $0x50] ss:$8 sps:$4 sm:$0xff]   ;;  %v3651_v30 = vld [vmem:[#allocation4 + $0x64] ss:$8 sps:$4 sm:$0xff]  }
 0x1ef   :  { %2019 = vmatprep.subr.bf16.mxu1 %v3492_v31  ;;  %v3553_v31 = vld [vmem:[#allocation2 + $0x4c8] ss:$16 sps:$4 sm:$0xff]  }
 0x1f1   :  { %1938 = vmatpush1.bf16.msra.mxu0 %v3487_v32  ;;  %v3558_v32 = vld [vmem:[#allocation2 + $0x4ec] ss:$16 sps:$4 sm:$0xff]  }
 0x1f2   :  { %2020 = vmatpush1.bf16.msra.mxu1 %v3490_v33  ;;  %1939 = vmatprep.subr.bf16.mxu0 %v3495_v34  ;;  %v3649_v33 = vld [vmem:[#allocation4 + $0x60] ss:$8 sps:$4 sm:$0xff]   ;;  %v3654_v34 = vld [vmem:[#allocation4 + $0x74] ss:$8 sps:$4 sm:$0xff]  }
 0x1f3   :  { %2021 = vmatprep.subr.bf16.mxu1 %v3498_v7  ;;  %v3556_v7 = vld [vmem:[#allocation2 + $0x4e8] ss:$16 sps:$4 sm:$0xff]  }
 0x1f5   :  { %1940 = vmatpush1.bf16.msra.mxu0 %v3493_v35  ;;  %v3561_v35 = vld [vmem:[#allocation2 + $0x50c] ss:$16 sps:$4 sm:$0xff]  }
 0x1f6   :  { %2022 = vmatpush1.bf16.msra.mxu1 %v3496_v12  ;;  %1941 = vmatprep.subr.bf16.mxu0 %v3501_v36  ;;  %v3652_v12 = vld [vmem:[#allocation4 + $0x70] ss:$8 sps:$4 sm:$0xff]  }
 0x1f7   :  { %2023 = vmatprep.subr.bf16.mxu1 %v3504_v63  ;;  %v3559_v36 = vld [vmem:[#allocation2 + $0x508] ss:$16 sps:$4 sm:$0xff]   ;;  %v3564_v63 = vld [vmem:[#allocation2 + $0x52c] ss:$16 sps:$4 sm:$0xff]  }
 0x1f9   :  { %1942 = vmatpush1.bf16.msra.mxu0 %v3499_v37  ;;  %v3562_v37 = vld [vmem:[#allocation2 + $0x528] ss:$16 sps:$4 sm:$0xff]  }
 0x1fa   :  { %2024 = vmatpush1.bf16.msra.mxu1 %v3502_v10  ;;  %1943 = vmatprep.subr.bf16.mxu0 %v3507_v38  ;;  %v3567_v10 = vld [vmem:[#allocation2 + $0x54c] ss:$16 sps:$4 sm:$0xff]   ;;  %v3565_v38 = vld [vmem:[#allocation2 + $0x548] ss:$16 sps:$4 sm:$0xff]  }
 0x1fb   :  { %2025 = vmatprep.subr.bf16.mxu1 %v3510_v17  ;;  %v3570_v17 = vld [vmem:[#allocation2 + $0x56c] ss:$16 sps:$4 sm:$0xff]  }
 0x1fd   :  { %1944 = vmatpush1.bf16.msra.mxu0 %v3505_v40  ;;  %v3568_v40 = vld [vmem:[#allocation2 + $0x568] ss:$16 sps:$4 sm:$0xff]  }
 0x1fe   :  { %2026 = vmatpush1.bf16.msra.mxu1 %v3508_v41  ;;  %1945 = vmatprep.subr.bf16.mxu0 %v3513_v44  ;;  %v3573_v41 = vld [vmem:[#allocation2 + $0x58c] ss:$16 sps:$4 sm:$0xff]   ;;  %v3571_v44 = vld [vmem:[#allocation2 + $0x588] ss:$16 sps:$4 sm:$0xff]  }
 0x1ff   :  { %2027 = vmatprep.subr.bf16.mxu1 %v3516_v45  ;;  %v3576_v45 = vld [vmem:[#allocation2 + $0x5ac] ss:$16 sps:$4 sm:$0xff]  }
 0x201   :  { %1946 = vmatpush1.bf16.msra.mxu0 %v3511_v47  ;;  %v3574_v47 = vld [vmem:[#allocation2 + $0x5a8] ss:$16 sps:$4 sm:$0xff]  }
 0x202   :  { %2028 = vmatpush1.bf16.msra.mxu1 %v3514_v48  ;;  %1947 = vmatprep.subr.bf16.mxu0 %v3519_v49  ;;  %v3579_v48 = vld [vmem:[#allocation2 + $0x5cc] ss:$16 sps:$4 sm:$0xff]   ;;  %v3577_v49 = vld [vmem:[#allocation2 + $0x5c8] ss:$16 sps:$4 sm:$0xff]  }
 0x203   :  { %2029 = vmatprep.subr.bf16.mxu1 %v3522_v50  ;;  %v3582_v50 = vld [vmem:[#allocation2 + $0x5ec] ss:$16 sps:$4 sm:$0xff]  }
 0x205   :  { %1948 = vmatpush1.bf16.msra.mxu0 %v3517_v51  ;;  %v3580_v51 = vld [vmem:[#allocation2 + $0x5e8] ss:$16 sps:$4 sm:$0xff]  }
 0x206   :  { %2030 = vmatpush1.bf16.msra.mxu1 %v3520_v52  ;;  %1949 = vmatprep.subr.bf16.mxu0 %v3525_v53  ;;  %v3585_v52 = vld [vmem:[#allocation2 + $0x60c] ss:$16 sps:$4 sm:$0xff]   ;;  %v3583_v53 = vld [vmem:[#allocation2 + $0x608] ss:$16 sps:$4 sm:$0xff]  }
 0x207   :  { %2031 = vmatprep.subr.bf16.mxu1 %v3528_v54  ;;  %v3588_v54 = vld [vmem:[#allocation2 + $0x62c] ss:$16 sps:$4 sm:$0xff]  }
 0x209   :  { %1950 = vmatpush1.bf16.msra.mxu0 %v3523_v56  ;;  %v3586_v56 = vld [vmem:[#allocation2 + $0x628] ss:$16 sps:$4 sm:$0xff]  }
 0x20a   :  { %2032 = vmatpush1.bf16.msra.mxu1 %v3526_v58  ;;  %1951 = vmatprep.subr.bf16.mxu0 %v3531_v59  ;;  %v3591_v58 = vld [vmem:[#allocation2 + $0x64c] ss:$16 sps:$4 sm:$0xff]   ;;  %v3589_v59 = vld [vmem:[#allocation2 + $0x648] ss:$16 sps:$4 sm:$0xff]  }
 0x20b   :  { %2033 = vmatprep.subr.bf16.mxu1 %v3534_v60  ;;  %v3594_v60 = vld [vmem:[#allocation2 + $0x66c] ss:$16 sps:$4 sm:$0xff]  }
 0x20d   :  { %1952 = vmatpush1.bf16.msra.mxu0 %v3529_v5  ;;  %v3592_v5 = vld [vmem:[#allocation2 + $0x668] ss:$16 sps:$4 sm:$0xff]  }
 0x20e   :  { %2034 = vmatpush1.bf16.msra.mxu1 %v3532_v61  ;;  %2562 = vmatprep.subr.bf16.mxu0 %v3633_v9  ;;  %v3597_v61 = vld [vmem:[#allocation2 + $0x68c] ss:$16 sps:$4 sm:$0xff]  }
 0x20f   :  { %2044 = vmatprep.subr.bf16.mxu1 %v3537_v4  ;;  %v3595_v4 = vld [vmem:[#allocation2 + $0x688] ss:$16 sps:$4 sm:$0xff]   ;;  %v3657_v9 = vld [vmem:[#allocation4 + $0x84] ss:$8 sps:$4 sm:$0xff]  }
 0x210   :  { %1954 = vmatmul.mubr.bf16.vlgmr.msra.gmra.mrb[0].mxu0 %v4076_v3 }
 0x211   :  { %2036 = vmatmul.mubr.bf16.vlgmr.msra.gmra.mrb[4].mxu1 %v4054_v43  ;;  %2563 = vmatpush1.bf16.msra.mxu0 %v3631_v42  ;;  %v3637_v43 = vld [vmem:[#allocation4 + $0x20] ss:$8 sps:$4 sm:$0xff]  }
 0x212   :  { %2045 = vmatpush1.bf16.msra.mxu1 %v3535_v1  ;;  %2076 = vmatprep.mubr.bf16.mxu1 %v4059_v46  ;;  %v3549_v46 = vld [vmem:[#allocation2 + $0x48c] ss:$16 sps:$4 sm:$0xff]  }
 0x213   :  { %2046 = vmatprep.subr.bf16.mxu1 %v3540_v6  ;;  %2564 = vmatprep.subr.bf16.mxu0 %v3636_v2  ;;  %v3600_v1 = vld [vmem:[#allocation2 + $0x6ac] ss:$16 sps:$4 sm:$0xff]   ;;  %v3655_v2 = vld [vmem:[#allocation4 + $0x80] ss:$8 sps:$4 sm:$0xff]  }
 0x215   :  { %2565 = vmatpush1.bf16.msra.mxu0 %v3634_v19  ;;  %v3601_v19 = vld [vmem:[#allocation2 + $0x6c8] ss:$16 sps:$4 sm:$0xff]  }
 0x216   :  { %2047 = vmatpush1.bf16.msra.mxu1 %v3538_v18  ;;  %2566 = vmatprep.subr.bf16.mxu0 %v3639_v11  ;;  %v3606_v11 = vld [vmem:[#allocation2 + $0x6ec] ss:$16 sps:$4 sm:$0xff]  }
 0x217   :  { %2048 = vmatprep.subr.bf16.mxu1 %v3543_v39 }
 0x219   :  { %2567 = vmatpush1.bf16.msra.mxu0 %v3637_v43  ;;  %v3604_v43 = vld [vmem:[#allocation2 + $0x6e8] ss:$16 sps:$4 sm:$0xff]  }
 0x21a   :  { %2049 = vmatpush1.bf16.msra.mxu1 %v3541_v20  ;;  %2568 = vmatprep.subr.bf16.mxu0 %v3642_v13  ;;  %v3660_v20 = vld [vmem:[#allocation4 + $0x94] ss:$8 sps:$4 sm:$0xff]  }
 0x21b   :  { %2050 = vmatprep.subr.bf16.mxu1 %v3546_v21  ;;  %v3658_v21 = vld [vmem:[#allocation4 + $0x90] ss:$8 sps:$4 sm:$0xff]   ;;  %v3609_v13 = vld [vmem:[#allocation2 + $0x70c] ss:$16 sps:$4 sm:$0xff]  }
 0x21d   :  { %2569 = vmatpush1.bf16.msra.mxu0 %v3640_v23  ;;  %v3607_v23 = vld [vmem:[#allocation2 + $0x708] ss:$16 sps:$4 sm:$0xff]  }
 0x21e   :  { %2051 = vmatpush1.bf16.msra.mxu1 %v3544_v22  ;;  %2570 = vmatprep.subr.bf16.mxu0 %v3645_v24  ;;  %v3663_v22 = vld [vmem:[#allocation4 + $0xa4] ss:$8 sps:$4 sm:$0xff]  }
 0x21f   :  { %2052 = vmatprep.subr.bf16.mxu1 %v3549_v46  ;;  %v3661_v46 = vld [vmem:[#allocation4 + $0xa0] ss:$8 sps:$4 sm:$0xff]   ;;  %v3612_v24 = vld [vmem:[#allocation2 + $0x72c] ss:$16 sps:$4 sm:$0xff]  }
 0x221   :  { %2571 = vmatpush1.bf16.msra.mxu0 %v3643_v15  ;;  %v3669_v15 = vld [vmem:[#allocation4 + $0xc4] ss:$8 sps:$4 sm:$0xff]  }
 0x222   :  { %2053 = vmatpush1.bf16.msra.mxu1 %v3547_v25  ;;  %2572 = vmatprep.subr.bf16.mxu0 %v3648_v26  ;;  %v3666_v25 = vld [vmem:[#allocation4 + $0xb4] ss:$8 sps:$4 sm:$0xff]   ;;  %v3610_v26 = vld [vmem:[#allocation2 + $0x728] ss:$16 sps:$4 sm:$0xff]  }
 0x223   :  { %2054 = vmatprep.subr.bf16.mxu1 %v3552_v8  ;;  %v3664_v8 = vld [vmem:[#allocation4 + $0xb0] ss:$8 sps:$4 sm:$0xff]  }
 0x225   :  { %2573 = vmatpush1.bf16.msra.mxu0 %v3646_v29  ;;  %v3672_v29 = vld [vmem:[#allocation4 + $0xd4] ss:$8 sps:$4 sm:$0xff]  }
 0x226   :  { %2055 = vmatpush1.bf16.msra.mxu1 %v3550_v27  ;;  %2574 = vmatprep.subr.bf16.mxu0 %v3651_v30  ;;  %v3615_v27 = vld [vmem:[#allocation2 + $0x74c] ss:$16 sps:$4 sm:$0xff]   ;;  %v3613_v30 = vld [vmem:[#allocation2 + $0x748] ss:$16 sps:$4 sm:$0xff]  }
 0x227   :  { %2056 = vmatprep.subr.bf16.mxu1 %v3555_v28  ;;  %v3667_v28 = vld [vmem:[#allocation4 + $0xc0] ss:$8 sps:$4 sm:$0xff]  }
 0x229   :  { %2575 = vmatpush1.bf16.msra.mxu0 %v3649_v33  ;;  %v3675_v33 = vld [vmem:[#allocation4 + $0xe4] ss:$8 sps:$4 sm:$0xff]  }
 0x22a   :  { %2057 = vmatpush1.bf16.msra.mxu1 %v3553_v31  ;;  %2576 = vmatprep.subr.bf16.mxu0 %v3654_v34  ;;  %v3618_v31 = vld [vmem:[#allocation2 + $0x76c] ss:$16 sps:$4 sm:$0xff]   ;;  %v3616_v34 = vld [vmem:[#allocation2 + $0x768] ss:$16 sps:$4 sm:$0xff]  }
 0x22b   :  { %2058 = vmatprep.subr.bf16.mxu1 %v3558_v32  ;;  %v3670_v32 = vld [vmem:[#allocation4 + $0xd0] ss:$8 sps:$4 sm:$0xff]  }
 0x22d   :  { %2577 = vmatpush1.bf16.msra.mxu0 %v3652_v12  ;;  %v3678_v12 = vld [vmem:[#allocation4 + $0xf4] ss:$8 sps:$4 sm:$0xff]  }
 0x22e   :  { %2059 = vmatpush1.bf16.msra.mxu1 %v3556_v7  ;;  %2578 = vmatprep.subr.bf16.mxu0 %v3657_v9  ;;  %v3621_v7 = vld [vmem:[#allocation2 + $0x78c] ss:$16 sps:$4 sm:$0xff]  }
 0x22f   :  { %2060 = vmatprep.subr.bf16.mxu1 %v3561_v35  ;;  %v3673_v35 = vld [vmem:[#allocation4 + $0xe0] ss:$8 sps:$4 sm:$0xff]  }
 0x231   :  { %2579 = vmatpush1.bf16.msra.mxu0 %v3655_v2 }
 0x232   :  { %2061 = vmatpush1.bf16.msra.mxu1 %v3559_v36  ;;  %2580 = vmatprep.subr.bf16.mxu0 %v3660_v20  ;;  %v3619_v36 = vld [vmem:[#allocation2 + $0x788] ss:$16 sps:$4 sm:$0xff]  }
 0x233   :  { %2062 = vmatprep.subr.bf16.mxu1 %v3564_v63  ;;  %v3624_v63 = vld [vmem:[#allocation2 + $0x7ac] ss:$16 sps:$4 sm:$0xff]  }
 0x235   :  { %2581 = vmatpush1.bf16.msra.mxu0 %v3658_v21 }
 0x236   :  { %2063 = vmatpush1.bf16.msra.mxu1 %v3562_v37  ;;  %2582 = vmatprep.subr.bf16.mxu0 %v3663_v22  ;;  %v3676_v37 = vld [vmem:[#allocation4 + $0xf0] ss:$8 sps:$4 sm:$0xff]   ;;  %v3684_v22 = vld [vmem:[#allocation4 + $0x114] ss:$8 sps:$4 sm:$0xff]  }
 0x237   :  { %2064 = vmatprep.subr.bf16.mxu1 %v3567_v10  ;;  %v3622_v10 = vld [vmem:[#allocation2 + $0x7a8] ss:$16 sps:$4 sm:$0xff]  }
 0x239   :  { %2583 = vmatpush1.bf16.msra.mxu0 %v3661_v46  ;;  %v3682_v46 = vld [vmem:[#allocation4 + $0x110] ss:$8 sps:$4 sm:$0xff]  }
 0x23a   :  { %2065 = vmatpush1.bf16.msra.mxu1 %v3565_v38  ;;  %2584 = vmatprep.subr.bf16.mxu0 %v3666_v25  ;;  %v3627_v38 = vld [vmem:[#allocation2 + $0x7cc] ss:$16 sps:$4 sm:$0xff]  }
 0x23b   :  { %2066 = vmatprep.subr.bf16.mxu1 %v3570_v17  ;;  %v3681_v17 = vld [vmem:[#allocation4 + $0x104] ss:$8 sps:$4 sm:$0xff]   ;;  %v3690_v25 = vld [vmem:[#allocation4 + $0x134] ss:$8 sps:$4 sm:$0xff]  }
 0x23d   :  { %2585 = vmatpush1.bf16.msra.mxu0 %v3664_v8  ;;  %v3688_v8 = vld [vmem:[#allocation4 + $0x130] ss:$8 sps:$4 sm:$0xff]  }
 0x23e   :  { %2067 = vmatpush1.bf16.msra.mxu1 %v3568_v40  ;;  %2586 = vmatprep.subr.bf16.mxu0 %v3669_v15  ;;  %v3625_v40 = vld [vmem:[#allocation2 + $0x7c8] ss:$16 sps:$4 sm:$0xff]   ;;  %v3693_v15 = vld [vmem:[#allocation4 + $0x144] ss:$8 sps:$4 sm:$0xff]  }
 0x23f   :  { %2068 = vmatprep.subr.bf16.mxu1 %v3573_v41  ;;  %v3630_v41 = vld [vmem:[#allocation2 + $0x7ec] ss:$16 sps:$4 sm:$0xff]  }
 0x241   :  { %2587 = vmatpush1.bf16.msra.mxu0 %v3667_v28  ;;  %v3694_v28 = vld [vmem:[#allocation4 + $0x150] ss:$8 sps:$4 sm:$0xff]  }
 0x242   :  { %2069 = vmatpush1.bf16.msra.mxu1 %v3571_v44  ;;  %2588 = vmatprep.subr.bf16.mxu0 %v3672_v29  ;;  %v3628_v44 = vld [vmem:[#allocation2 + $0x7e8] ss:$16 sps:$4 sm:$0xff]   ;;  %v3699_v29 = vld [vmem:[#allocation4 + $0x164] ss:$8 sps:$4 sm:$0xff]  }
 0x243   :  { %2070 = vmatprep.subr.bf16.mxu1 %v3576_v45  ;;  %v4091_v45 = vld [vmem:[%s4118_s4] sm:$0xf] }
 0x245   :  { %2589 = vmatpush1.bf16.msra.mxu0 %v3670_v32  ;;  %v3700_v32 = vld [vmem:[#allocation4 + $0x170] ss:$8 sps:$4 sm:$0xff]  }
 0x246   :  { %2071 = vmatpush1.bf16.msra.mxu1 %v3574_v47  ;;  %2590 = vmatprep.subr.bf16.mxu0 %v3675_v33  ;;  %v501_v47 = vrot.slane %v4091_v45, %v4024_v16  ;;  %v3705_v33 = vld [vmem:[#allocation4 + $0x184] ss:$8 sps:$4 sm:$0xff]  }
 0x247   :  { %2072 = vmatprep.subr.bf16.mxu1 %v3579_v48  ;;  %v505_v48 = vrot.slane %v4091_v45, %v4020_v62 }
 0x249   :  { %2591 = vmatpush1.bf16.msra.mxu0 %v3673_v35  ;;  %v3706_v35 = vld [vmem:[#allocation4 + $0x190] ss:$8 sps:$4 sm:$0xff]  }
 0x24a   :  { %2073 = vmatpush1.bf16.msra.mxu1 %v3577_v49  ;;  %2592 = vmatprep.subr.bf16.mxu0 %v3678_v12  ;;  %v3711_v12 = vld [vmem:[#allocation4 + $0x1a4] ss:$8 sps:$4 sm:$0xff]  }
 0x24b   :  { %2074 = vmatprep.subr.bf16.mxu1 %v3582_v50 }
 0x24d   :  { %2593 = vmatpush1.bf16.msra.mxu0 %v3676_v37  ;;  %v3712_v37 = vld [vmem:[#allocation4 + $0x1b0] ss:$8 sps:$4 sm:$0xff]  }
 0x24e   :  { %2075 = vmatpush1.bf16.msra.mxu1 %v3580_v51  ;;  %2603 = vmatprep.subr.bf16.mxu0 %v3681_v17  ;;  %v3720_v17 = vld [vmem:[#allocation4 + $0x1d4] ss:$8 sps:$4 sm:$0xff]  }
 0x24f   :  { %2085 = vmatprep.subr.bf16.mxu1 %v3585_v52 }
 0x251   :  { %2077 = vmatmul.mubr.bf16.vlgmr.msra.gmra.mrb[4].mxu1 %v4064_v55  ;;  %v3598_v55 = vld [vmem:[#allocation2 + $0x6a8] ss:$16 sps:$4 sm:$0xff]  }
 0x252   :  { %2086 = vmatpush1.bf16.msra.mxu1 %v3583_v53  ;;  %2117 = vmatprep.mubr.bf16.mxu1 %v4068_v57  ;;  %v3603_v57 = vld [vmem:[#allocation2 + $0x6cc] ss:$16 sps:$4 sm:$0xff]  }
 0x253   :  { %2087 = vmatprep.subr.bf16.mxu1 %v3588_v54 }
 0x256   :  { %2088 = vmatpush1.bf16.msra.mxu1 %v3586_v56 }
 0x257   :  { %2089 = vmatprep.subr.bf16.mxu1 %v3591_v58 }
 0x25a   :  { %2090 = vmatpush1.bf16.msra.mxu1 %v3589_v59 }
 0x25b   :  { %2091 = vmatprep.subr.bf16.mxu1 %v3594_v60 }
 0x25e   :  { %2092 = vmatpush1.bf16.msra.mxu1 %v3592_v5 }
 0x25f   :  { %2093 = vmatprep.subr.bf16.mxu1 %v3597_v61 }
 0x262   :  { %2094 = vmatpush1.bf16.msra.mxu1 %v3595_v4 }
 0x263   :  { %v4083_v6 = vpop.f32.mrb[0].mxu1  ;;  %2095 = vmatprep.subr.bf16.mxu1 %v3600_v1 }
 0x264   :  { %v4085_v42 = vpop.f32.mrb[1].mxu1  ;;  %v1833_v49 = vadd.f32 %v4083_v6, %v501_v47  ;;  %v3726_v47 = vld [vmem:[#allocation4 + $0x1f4] ss:$8 sps:$4 sm:$0xff]  }
 0x265   :  { %v1836_v18 = vpop.f32.mrb[2].mxu1  ;;  %v1835_v50 = vadd.f32 %v4085_v42, %v505_v48  ;;  %v3724_v48 = vld [vmem:[#allocation4 + $0x1f0] ss:$8 sps:$4 sm:$0xff]  }
 0x266   :  { %2096 = vmatpush1.bf16.msra.mxu1 %v3598_v55  ;;  %v1837_v39 = vpop.f32.mrb[3].mxu1 }
 0x267   :  { %2097 = vmatprep.subr.bf16.mxu1 %v3603_v57 }
 0x26a   :  { %2098 = vmatpush1.bf16.msra.mxu1 %v3601_v19 }
 0x26b   :  { %2099 = vmatprep.subr.bf16.mxu1 %v3606_v11 }
 0x26e   :  { %2100 = vmatpush1.bf16.msra.mxu1 %v3604_v43  ;;  %v3679_v43 = vld [vmem:[#allocation4 + $0x100] ss:$8 sps:$4 sm:$0xff]  }
 0x26f   :  { %2101 = vmatprep.subr.bf16.mxu1 %v3609_v13 }
 0x272   :  { %2102 = vmatpush1.bf16.msra.mxu1 %v3607_v23  ;;  %v3687_v23 = vld [vmem:[#allocation4 + $0x124] ss:$8 sps:$4 sm:$0xff]  }
 0x273   :  { %2103 = vmatprep.subr.bf16.mxu1 %v3612_v24  ;;  %v3685_v24 = vld [vmem:[#allocation4 + $0x120] ss:$8 sps:$4 sm:$0xff]  }
 0x276   :  { %2104 = vmatpush1.bf16.msra.mxu1 %v3610_v26  ;;  %v3691_v26 = vld [vmem:[#allocation4 + $0x140] ss:$8 sps:$4 sm:$0xff]  }
 0x277   :  { %2105 = vmatprep.subr.bf16.mxu1 %v3615_v27  ;;  %v3696_v27 = vld [vmem:[#allocation4 + $0x154] ss:$8 sps:$4 sm:$0xff]  }
 0x27a   :  { %2106 = vmatpush1.bf16.msra.mxu1 %v3613_v30  ;;  %v3697_v30 = vld [vmem:[#allocation4 + $0x160] ss:$8 sps:$4 sm:$0xff]  }
 0x27b   :  { %2107 = vmatprep.subr.bf16.mxu1 %v3618_v31  ;;  %v3702_v31 = vld [vmem:[#allocation4 + $0x174] ss:$8 sps:$4 sm:$0xff]  }
 0x27e   :  { %2108 = vmatpush1.bf16.msra.mxu1 %v3616_v34  ;;  %v3703_v34 = vld [vmem:[#allocation4 + $0x180] ss:$8 sps:$4 sm:$0xff]  }
 0x27f   :  { %2109 = vmatprep.subr.bf16.mxu1 %v3621_v7  ;;  %v3708_v7 = vld [vmem:[#allocation4 + $0x194] ss:$8 sps:$4 sm:$0xff]  }
 0x282   :  { %2110 = vmatpush1.bf16.msra.mxu1 %v3619_v36  ;;  %v3709_v36 = vld [vmem:[#allocation4 + $0x1a0] ss:$8 sps:$4 sm:$0xff]  }
 0x283   :  { %2111 = vmatprep.subr.bf16.mxu1 %v3624_v63  ;;  %v3714_v63 = vld [vmem:[#allocation4 + $0x1b4] ss:$8 sps:$4 sm:$0xff]  }
 0x286   :  { %2112 = vmatpush1.bf16.msra.mxu1 %v3622_v10  ;;  %v3717_v10 = vld [vmem:[#allocation4 + $0x1c4] ss:$8 sps:$4 sm:$0xff]  }
 0x287   :  { %2113 = vmatprep.subr.bf16.mxu1 %v3627_v38  ;;  %v3715_v38 = vld [vmem:[#allocation4 + $0x1c0] ss:$8 sps:$4 sm:$0xff]  }
 0x28a   :  { %2114 = vmatpush1.bf16.msra.mxu1 %v3625_v40  ;;  %v3718_v40 = vld [vmem:[#allocation4 + $0x1d0] ss:$8 sps:$4 sm:$0xff]  }
 0x28b   :  { %2115 = vmatprep.subr.bf16.mxu1 %v3630_v41  ;;  %v3723_v41 = vld [vmem:[#allocation4 + $0x1e4] ss:$8 sps:$4 sm:$0xff]  }
 0x28e   :  { %2116 = vmatpush1.bf16.msra.mxu1 %v3628_v44  ;;  %v3721_v44 = vld [vmem:[#allocation4 + $0x1e0] ss:$8 sps:$4 sm:$0xff]  }
 0x291   :  { %2118 = vmatmul.mubr.bf16.vlgmr.msra.gmra.mrb[4].mxu1 %v4076_v3 }
 0x2e3   :  { %v1955_v51 = vpop.f32.mrb[0].mxu0 }
 0x2e4   :  { %v3207_v52 = vadd.f32 %v1955_v51, %v1833_v49  ;;  %v1957_v53 = vpop.f32.mrb[1].mxu0  ;;  %v509_v49 = vrot.slane %v4091_v45, %v4026_v0 }
 0x2e5   :  { %v3209_v54 = vadd.f32 %v1957_v53, %v1835_v50  ;;  %v1959_v3 = vpop.f32.mrb[2].mxu0  ;;  %v513_v50 = vrot.slane %v4091_v45, %v4022_v14 }
 0x2e6   :  { %v2126_v56 = vmul.f32 %v3207_v52, %v3207_v52  ;;  %v1960_v58 = vpop.f32.mrb[3].mxu0 }
 0x2e7   :  { %v2127_v59 = vmul.f32 %v3209_v54, %v3209_v54 }
 0x2e8   :  { %v2130_v60 = vmul.f32 %v3207_v52, %v2126_v56 }
 0x2e9   :  { %v2131_v5 = vmul.f32 %v3209_v54, %v2127_v59 }
 0x2ea   :  { %v2134_v61 = vmul.f32 0.044715, %v2130_v60 }
 0x2eb   :  { %v2135_v4 = vmul.f32 0.044715, %v2131_v5 }
 0x2ec   :  { %v2138_v1 = vadd.f32 %v3207_v52, %v2134_v61 }
 0x2ed   :  { %v2139_v55 = vadd.f32 %v3209_v54, %v2135_v4 }
 0x2ee   :  { %v2142_v57 = vmul.f32 0.7978846, %v2138_v1 }
 0x2ef   :  { %v2143_v9 = vmul.f32 0.7978846, %v2139_v55 }
 0x2f0   :  { %3745 = vtanh.f32 %v2142_v57 }
 0x2f1   :  { %3747 = vtanh.f32 %v2143_v9 }
 0x2fa   :  { %v3746_v6 = vpop.eup %3745 }
 0x2fb   :  { %v3748_v42 = vpop.eup %3747  ;;  %v2150_v18 = vadd.f32 1.0, %v3746_v6 }
 0x2fc   :  { %v2151_v2 = vadd.f32 1.0, %v3748_v42 }
 0x2fd   :  { %v2154_v39 = vmul.f32 0.5, %v2150_v18 }
 0x2fe   :  { %v2155_v19 = vmul.f32 0.5, %v2151_v2 }
 0x2ff   :  { %v2158_v11 = vmul.f32 %v3207_v52, %v2154_v39 }
 0x300   :  { %v2159_v20 = vmul.f32 %v3209_v54, %v2155_v19 }
 0x301   :  { %v2162_v13 = vpack.c.bf16 %v2158_v11, %v2158_v11 }
 0x302   :  { %v2163_v21 = vpack.c.bf16 %v2159_v20, %v2159_v20  ;;  %v3727_v20 = vld [vmem:[#allocation6 + $0x40] sm:$0xff]  }
 0x303   :  { %3184 = vmatprep.subr.bf16.mxu1 %v3727_v20 }
 0x304   :  { %2594 = vmatprep.mubr.bf16.mxu0 %v2163_v21  ;;  %v3728_v21 = vld [vmem:[#allocation6] sm:$0xff]  }
 0x305   :  { %2595 = vmatmul.mubr.bf16.vlgmr.msra.gmra.mrb[4].mxu0 %v2162_v13  ;;  %3185 = vmatpush3.bf16.msra.mxu1 %v3728_v21  ;;  %v3730_v13 = vld [vmem:[#allocation6 + $0x8] sm:$0xff]  }
 0x306   :  { %2604 = vmatpush1.bf16.msra.mxu0 %v3679_v43  ;;  %v3729_v43 = vld [vmem:[#allocation6 + $0x48] sm:$0xff]  }
 0x307   :  { %2605 = vmatprep.subr.bf16.mxu0 %v3684_v22  ;;  %3186 = vmatprep.subr.bf16.mxu1 %v3729_v43  ;;  %v3731_v22 = vld [vmem:[#allocation6 + $0x50] sm:$0xff]  }
 0x309   :  { %3187 = vmatpush3.bf16.msra.mxu1 %v3730_v13 }
 0x30a   :  { %2606 = vmatpush1.bf16.msra.mxu0 %v3682_v46  ;;  %v3732_v46 = vld [vmem:[#allocation6 + $0x10] sm:$0xff]   ;;  %3188 = vmatprep.subr.bf16.mxu1 %v3731_v22 }
 0x30b   :  { %2607 = vmatprep.subr.bf16.mxu0 %v3687_v23  ;;  %v3733_v23 = vld [vmem:[#allocation6 + $0x58] sm:$0xff]  }
 0x30d   :  { %3189 = vmatpush3.bf16.msra.mxu1 %v3732_v46 }
 0x30e   :  { %2608 = vmatpush1.bf16.msra.mxu0 %v3685_v24  ;;  %v3734_v24 = vld [vmem:[#allocation6 + $0x18] sm:$0xff]   ;;  %3190 = vmatprep.subr.bf16.mxu1 %v3733_v23 }
 0x30f   :  { %2609 = vmatprep.subr.bf16.mxu0 %v3690_v25  ;;  %v3735_v25 = vld [vmem:[#allocation6 + $0x60] sm:$0xff]  }
 0x311   :  { %3191 = vmatpush3.bf16.msra.mxu1 %v3734_v24 }
 0x312   :  { %2610 = vmatpush1.bf16.msra.mxu0 %v3688_v8  ;;  %v3736_v8 = vld [vmem:[#allocation6 + $0x20] sm:$0xff]   ;;  %3192 = vmatprep.subr.bf16.mxu1 %v3735_v25 }
 0x313   :  { %2611 = vmatprep.subr.bf16.mxu0 %v3693_v15  ;;  %v3737_v15 = vld [vmem:[#allocation6 + $0x68] sm:$0xff]  }
 0x315   :  { %3193 = vmatpush3.bf16.msra.mxu1 %v3736_v8 }
 0x316   :  { %2612 = vmatpush1.bf16.msra.mxu0 %v3691_v26  ;;  %v3738_v26 = vld [vmem:[#allocation6 + $0x28] sm:$0xff]   ;;  %3194 = vmatprep.subr.bf16.mxu1 %v3737_v15 }
 0x317   :  { %2613 = vmatprep.subr.bf16.mxu0 %v3696_v27  ;;  %v3739_v27 = vld [vmem:[#allocation6 + $0x70] sm:$0xff]  }
 0x319   :  { %3195 = vmatpush3.bf16.msra.mxu1 %v3738_v26 }
 0x31a   :  { %2614 = vmatpush1.bf16.msra.mxu0 %v3694_v28  ;;  %v3740_v28 = vld [vmem:[#allocation6 + $0x30] sm:$0xff]   ;;  %3196 = vmatprep.subr.bf16.mxu1 %v3739_v27 }
 0x31b   :  { %2615 = vmatprep.subr.bf16.mxu0 %v3699_v29  ;;  %v3741_v29 = vld [vmem:[#allocation6 + $0x78] sm:$0xff]  }
 0x31d   :  { %3197 = vmatpush3.bf16.msra.mxu1 %v3740_v28 }
 0x31e   :  { %2616 = vmatpush1.bf16.msra.mxu0 %v3697_v30  ;;  %v3742_v30 = vld [vmem:[#allocation6 + $0x38] sm:$0xff]   ;;  %3198 = vmatprep.subr.bf16.mxu1 %v3741_v29 }
 0x31f   :  { %2617 = vmatprep.subr.bf16.mxu0 %v3702_v31  ;;  %v2230_v31 = vld [vmem:[%s4120_s6] sm:$0x3] }
 0x321   :  { %3199 = vmatpush3.bf16.msra.mxu1 %v3742_v30 }
 0x322   :  { %2618 = vmatpush1.bf16.msra.mxu0 %v3700_v32  ;;  %v2235_v32 = vrot.slane %v2230_v31, %v4024_v16 }
 0x323   :  { %2619 = vmatprep.subr.bf16.mxu0 %v3705_v33  ;;  %v2239_v33 = vrot.slane %v2230_v31, %v4020_v62 }
 0x326   :  { %2620 = vmatpush1.bf16.msra.mxu0 %v3703_v34 }
 0x327   :  { %2621 = vmatprep.subr.bf16.mxu0 %v3708_v7 }
 0x32a   :  { %2622 = vmatpush1.bf16.msra.mxu0 %v3706_v35 }
 0x32b   :  { %2623 = vmatprep.subr.bf16.mxu0 %v3711_v12 }
 0x32e   :  { %2624 = vmatpush1.bf16.msra.mxu0 %v3709_v36 }
 0x32f   :  { %2625 = vmatprep.subr.bf16.mxu0 %v3714_v63 }
 0x332   :  { %2626 = vmatpush1.bf16.msra.mxu0 %v3712_v37 }
 0x333   :  { %2627 = vmatprep.subr.bf16.mxu0 %v3717_v10 }
 0x336   :  { %2628 = vmatpush1.bf16.msra.mxu0 %v3715_v38 }
 0x337   :  { %2629 = vmatprep.subr.bf16.mxu0 %v3720_v17 }
 0x33a   :  { %2630 = vmatpush1.bf16.msra.mxu0 %v3718_v40 }
 0x33b   :  { %2631 = vmatprep.subr.bf16.mxu0 %v3723_v41 }
 0x33e   :  { %2632 = vmatpush1.bf16.msra.mxu0 %v3721_v44 }
 0x33f   :  { %2633 = vmatprep.subr.bf16.mxu0 %v3726_v47 }
 0x342   :  { %2634 = vmatpush1.bf16.msra.mxu0 %v3724_v48 }
 0x364   :  { %v2119_v51 = vpop.f32.mrb[4].mxu1 }
 0x365   :  { %v3210_v52 = vadd.f32 %v2119_v51, %v509_v49  ;;  %v2121_v53 = vpop.f32.mrb[5].mxu1 }
 0x366   :  { %v3211_v54 = vadd.f32 %v2121_v53, %v513_v50  ;;  %v2123_v3 = vpop.f32.mrb[6].mxu1 }
 0x367   :  { %v2128_v56 = vmul.f32 %v3210_v52, %v3210_v52  ;;  %v2124_v58 = vpop.f32.mrb[7].mxu1 }
 0x368   :  { %v2129_v59 = vmul.f32 %v3211_v54, %v3211_v54 }
 0x369   :  { %v2132_v60 = vmul.f32 %v3210_v52, %v2128_v56 }
 0x36a   :  { %v2133_v5 = vmul.f32 %v3211_v54, %v2129_v59 }
 0x36b   :  { %v2136_v61 = vmul.f32 0.044715, %v2132_v60  ;;  %v3167_v60 = vld [vmem:[%s4122_s8] ss:$0 sm:$0xff] }
 0x36c   :  { %v2137_v4 = vmul.f32 0.044715, %v2133_v5 }
 0x36d   :  { %v2140_v1 = vadd.f32 %v3210_v52, %v2136_v61 }
 0x36e   :  { %v2141_v55 = vadd.f32 %v3211_v54, %v2137_v4 }
 0x36f   :  { %v2144_v57 = vmul.f32 0.7978846, %v2140_v1 }
 0x370   :  { %v2145_v9 = vmul.f32 0.7978846, %v2141_v55 }
 0x371   :  { %3749 = vtanh.f32 %v2144_v57 }
 0x372   :  { %3751 = vtanh.f32 %v2145_v9 }
 0x37b   :  { %v3750_v0 = vpop.eup %3749 }
 0x37c   :  { %v3752_v14 = vpop.eup %3751  ;;  %v2152_v45 = vadd.f32 1.0, %v3750_v0 }
 0x37d   :  { %v2153_v6 = vadd.f32 1.0, %v3752_v14 }
 0x37e   :  { %v2156_v42 = vmul.f32 0.5, %v2152_v45 }
 0x37f   :  { %v2157_v18 = vmul.f32 0.5, %v2153_v6 }
 0x380   :  { %v2160_v2 = vmul.f32 %v3210_v52, %v2156_v42 }
 0x381   :  { %v2161_v39 = vmul.f32 %v3211_v54, %v2157_v18 }
 0x382   :  { %v2164_v11 = vpack.c.bf16 %v2160_v2, %v2160_v2 }
 0x383   :  { %v2165_v19 = vpack.c.bf16 %v2161_v39, %v2161_v39 }
 0x385   :  { %2635 = vmatprep.mubr.bf16.mxu0 %v2165_v19 }
 0x386   :  { %2636 = vmatmul.mubr.bf16.vlgmr.msra.gmra.mrb[4].mxu0 %v2164_v11 }
 0x459   :  { %v2637_v34 = vpop.f32.mrb[4].mxu0 }
 0x45a   :  { %v3212_v7 = vadd.f32 %v2637_v34, %v2235_v32  ;;  %v2639_v35 = vpop.f32.mrb[5].mxu0 }
 0x45b   :  { %v3213_v12 = vadd.f32 %v2639_v35, %v2239_v33  ;;  %v2641_v36 = vpop.f32.mrb[6].mxu0 }
 0x45c   :  { %v2644_v63 = vmul.f32 %v3212_v7, %v3212_v7  ;;  %v2642_v37 = vpop.f32.mrb[7].mxu0 }
 0x45d   :  { %v2645_v10 = vmul.f32 %v3213_v12, %v3213_v12 }
 0x45e   :  { %v2646_v38 = vmul.f32 %v3212_v7, %v2644_v63 }
 0x45f   :  { %v2647_v17 = vmul.f32 %v3213_v12, %v2645_v10 }
 0x460   :  { %v2648_v40 = vmul.f32 0.044715, %v2646_v38 }
 0x461   :  { %v2649_v41 = vmul.f32 0.044715, %v2647_v17 }
 0x462   :  { %v2650_v44 = vadd.f32 %v3212_v7, %v2648_v40 }
 0x463   :  { %v2651_v47 = vadd.f32 %v3213_v12, %v2649_v41 }
 0x464   :  { %v2652_v48 = vmul.f32 0.7978846, %v2650_v44 }
 0x465   :  { %v2653_v49 = vmul.f32 0.7978846, %v2651_v47 }
 0x466   :  { %3753 = vtanh.f32 %v2652_v48 }
 0x467   :  { %3755 = vtanh.f32 %v2653_v49 }
 0x470   :  { %v3754_v16 = vpop.eup %3753 }
 0x471   :  { %v3756_v62 = vpop.eup %3755  ;;  %v2656_v50 = vadd.f32 1.0, %v3754_v16 }
 0x472   :  { %v2657_v51 = vadd.f32 1.0, %v3756_v62 }
 0x473   :  { %v2658_v52 = vmul.f32 0.5, %v2656_v50 }
 0x474   :  { %v2659_v53 = vmul.f32 0.5, %v2657_v51 }
 0x475   :  { %v2660_v54 = vmul.f32 %v3212_v7, %v2658_v52 }
 0x476   :  { %v2661_v3 = vmul.f32 %v3213_v12, %v2659_v53 }
 0x477   :  { %v2662_v58 = vpack.c.bf16 %v2660_v54, %v2660_v54 }
 0x478   :  { %v2663_v56 = vpack.c.bf16 %v2661_v3, %v2661_v3 }
 0x47a   :  { %2831 = vmatprep.mubr.bf16.mxu1 %v2663_v56 }
 0x47b   :  { %2832 = vmatmul.mubr.bf16.vlgmr.msra.gmra.mrb[8].mxu1 %v2662_v58 }
 0x54e   :  { %v3200_v59 = vpop.f32.mrb[8].mxu1 }
 0x54f   :  { %v3201_v5 = vpop.f32.mrb[9].mxu1 }
 0x550   :  { %v3202_v61 = vadd.f32 %v3201_v5, %v3200_v59  ;;  %v3203_v4 = vpop.f32.mrb[10].mxu1 }
 0x551   :  { %v3204_v1 = vpop.f32.mrb[11].mxu1 }
 0x552   :  { %v2834_v55 = vadd.f32 %v3202_v61, %v3167_v60 }
 0x554   :  { %v2839_v57 = vpack.c.bf16 %v2834_v55, %v2834_v55 }
 0x556   :  { %2840 = vst [vmem:[%s4123_s9] sm:$0xf] %v2839_v57 }
 0x557   :  { %2845 = vsyncpa [#allocation3], 1 }
 0x558   :  { %2846 = vsyncpa [#allocation5], 1 }

</bundles_post_ra>
